<compile_context>
chip_gen: v5e
topology: v5e:2x2
jax: 0.10.0
libtpu: 0.0.40
codegen_flags: <defaults>
</compile_context>

<pallas_src>
import jax
import jax.numpy as jnp
from jax.experimental import pallas as pl
from jax.experimental.pallas import tpu as pltpu


def _relu_conv1x1_kernel(x_ref, w_ref, o_ref):
    # x_ref: (1, HW, Cin) f32   -- one batch element, lane-dense in Cin
    # w_ref: (Cin, Ct)    bf16  -- one Cout lane-tile of the transposed weight
    # o_ref: (1, HW, Ct)  f32   -- lane-dense in Cout (unmasked vst)
    xr = jnp.maximum(x_ref[0], 0.0).astype(w_ref.dtype)      # fused ReLU + cast (VPU)
    o_ref[0] = jnp.dot(
        xr, w_ref[...], preferred_element_type=jnp.float32   # MXU, f32 accumulation
    ).astype(o_ref.dtype)


def _num_cout_tiles():
    """Per-generation Cout split.  Default 2 (even split across v7x's two
    TensorCores; shallow DMA/compute/writeback overlap on v6e); 4 on v5e
    (slower HBM + MXU -> deeper pipeline).  Queried once at weight-prep time,
    not in the per-call hot path."""
    try:
        kind = jax.devices()[0].device_kind.lower()
    except Exception:
        return 2
    if "v5e" in kind or "v5 lite" in kind or "v5litepod" in kind:
        return 4
    return 2


def prepare_weight(weight, nt=None):
    """One-time parameter prep (run outside the per-call hot path).

    Accepts the Conv2d weight as [Cout, Cin] or [Cout, Cin, 1, 1].  Returns
    (wt, nt, cout) where wt is the bf16 transposed weight [Cin, Cout_pad] with
    Cout zero-padded to a multiple of 128*nt so each of the nt lane tiles is a
    multiple of 128 (BlockSpec (8,128) legality + unmasked stores).
    """
    if nt is None:
        nt = _num_cout_tiles()
    w = jnp.asarray(weight)
    w = w.reshape(w.shape[0], w.shape[1])          # [Cout, Cin]
    cout, _ = w.shape
    wt = w.T.astype(jnp.bfloat16)                  # [Cin, Cout]
    lane = 128 * nt
    cout_pad = ((cout + lane - 1) // lane) * lane
    if cout_pad != cout:
        wt = jnp.pad(wt, ((0, 0), (0, cout_pad - cout)))
    return wt, int(nt), int(cout)


def relu_conv1x1(x_nchw, w_prepared):
    """relu(x) followed by a 1x1 conv (no bias).

    x_nchw:     [N, Cin, H, W] float32
    w_prepared: (wt [Cin, Cout_pad] bf16, nt, cout) from prepare_weight
    returns     [N, Cout, H, W] float32
    """
    wt, nt, cout = w_prepared
    n, cin, h, w = x_nchw.shape
    hw = h * w
    cin_w, cout_pad = wt.shape
    assert cin_w == cin
    ct = cout_pad // nt
    assert ct * nt == cout_pad and ct % 128 == 0, (ct, nt, cout_pad)

    # Lane-dense ("NHWC") activation: free reshape + one cheap ~200 KB transpose.
    x3 = x_nchw.reshape(n, cin, hw).transpose(0, 2, 1)       # [N, HW, Cin]

    cost = pl.CostEstimate(
        flops=2 * n * cout * cin * hw,
        transcendentals=0,
        bytes_accessed=(
            x3.size * x3.dtype.itemsize
            + wt.size * wt.dtype.itemsize
            + n * cout_pad * hw * jnp.dtype(jnp.float32).itemsize
        ),
    )

    out3 = pl.pallas_call(
        _relu_conv1x1_kernel,
        out_shape=jax.ShapeDtypeStruct((n, hw, cout_pad), jnp.float32),
        grid=(n, nt),
        in_specs=[
            # Same x block for every j -> Pallas skips the re-DMA across j steps.
            pl.BlockSpec((1, hw, cin), lambda b, j: (b, 0, 0)),
            pl.BlockSpec((cin, ct), lambda b, j: (0, j)),
        ],
        out_specs=pl.BlockSpec((1, hw, ct), lambda b, j: (b, 0, j)),
        compiler_params=pltpu.CompilerParams(
            dimension_semantics=("parallel", "parallel")),
        cost_estimate=cost,
    )(x3, wt)

    # Drop Cout padding and go back to NCHW (cheap ~200 KB transpose; consumers
    # that accept NHWC can use out3[..., :cout] directly and skip it).
    return out3[:, :, :cout].transpose(0, 2, 1).reshape(n, cout, h, w)


if __name__ == "__main__":
    # Shapes implied by the module: input [1, 1008, 7, 7], Conv2d 1008->1008 1x1.
    N, C, H, W = 1, 1008, 7, 7
    key = jax.random.PRNGKey(0)
    kx, kw = jax.random.split(key)

    x = jax.random.normal(kx, (N, C, H, W), dtype=jnp.float32)
    # Deterministic synthetic weight for Conv2d(1008, 1008, kernel_size=1, bias=False).
    weight = jax.random.normal(kw, (C, C), dtype=jnp.float32) * 0.02

    w_prep = prepare_weight(weight)            # one-time, outside the hot path
    out = relu_conv1x1(x, w_prep)
    jax.block_until_ready(out)
    assert out.shape == (N, C, H, W)

    # Reference using the same bf16-rounded operands (kernel does bf16 x bf16
    # multiplies with f32 accumulation) -> only accumulation order differs.
    xr = jnp.maximum(x, 0.0).astype(jnp.bfloat16).astype(jnp.float32)
    wr = weight.astype(jnp.bfloat16).astype(jnp.float32)
    ref = jnp.einsum("oc,nchw->nohw", wr, xr)
    assert jnp.allclose(out, ref, atol=2e-3, rtol=2e-3)

    # Looser sanity check against the full-f32 PyTorch-style reference
    # (difference is only the bf16 rounding of weight/activation).
    ref_f32 = jnp.einsum("oc,nchw->nohw", weight, jnp.maximum(x, 0.0))
    assert jnp.allclose(out, ref_f32, atol=5e-2, rtol=5e-2)

    print("KERNEL_OK")
</pallas_src>

<mosaic_0001>
module attributes {stable_mosaic.version = 11 : i64} {
  func.func @_relu_conv1x1_kernel(%arg0: i32, %arg1: i32, %arg2: memref<1x49x1008xf32, #tpu.memory_space<vmem>>, %arg3: memref<1008x512xbf16, #tpu.memory_space<vmem>>, %arg4: memref<1x49x512xf32, #tpu.memory_space<vmem>>) attributes {dimension_semantics = [#tpu.dimension_semantics<parallel>, #tpu.dimension_semantics<parallel>], iteration_bounds = array<i64: 1, 2>, scalar_prefetch = 0 : i64, scratch_operands = 0 : i64, tpu.core_type = #tpu.core_type<tc>, window_params = [{transform_indices = @transform_0, window_bounds = array<i64: 1, 49, 1008>}, {transform_indices = @transform_1, window_bounds = array<i64: 1008, 512>}, {transform_indices = @transform_2, window_bounds = array<i64: 1, 49, 512>}]} {
    %c0 = arith.constant 0 : index
    %c0_0 = arith.constant 0 : index
    %c0_1 = arith.constant 0 : index
    %0 = vector.load %arg2[%c0, %c0_0, %c0_1] : memref<1x49x1008xf32, #tpu.memory_space<vmem>>, vector<1x49x1008xf32>
    %1 = vector.shape_cast %0 : vector<1x49x1008xf32> to vector<49x1008xf32>
    %cst = arith.constant 0.000000e+00 : f32
    %2 = vector.broadcast %cst : f32 to vector<49x1008xf32>
    %3 = arith.maximumf %1, %2 : vector<49x1008xf32>
    %4 = arith.truncf %3 : vector<49x1008xf32> to vector<49x1008xbf16>
    %c0_2 = arith.constant 0 : index
    %c0_3 = arith.constant 0 : index
    %5 = vector.load %arg3[%c0_2, %c0_3] : memref<1008x512xbf16, #tpu.memory_space<vmem>>, vector<1008x512xbf16>
    %cst_4 = arith.constant dense<0.000000e+00> : vector<49x512xf32>
    %6 = tpu.matmul %4, %5, %cst_4 {dimension_numbers = #tpu.dot_dimension_numbers<[1], [0], [0], [1], [0, 0, 1, 1], [], []>} : vector<49x1008xbf16>, vector<1008x512xbf16>, vector<49x512xf32> -> vector<49x512xf32>
    %c0_5 = arith.constant 0 : index
    %c0_6 = arith.constant 0 : index
    %c0_7 = arith.constant 0 : index
    %7 = vector.load %arg4[%c0_5, %c0_6, %c0_7] : memref<1x49x512xf32, #tpu.memory_space<vmem>>, vector<1x49x512xf32>
    %8 = vector.shape_cast %7 : vector<1x49x512xf32> to vector<49x512xf32>
    %9 = vector.shape_cast %6 : vector<49x512xf32> to vector<1x49x512xf32>
    tpu.vector_store %arg4[%c0_5, %c0_6, %c0_7], %9 {strides = array<i32>} : memref<1x49x512xf32, #tpu.memory_space<vmem>>, vector<1x49x512xf32>,
    return
  }
  func.func @transform_0(%arg0: i32, %arg1: i32) -> (i32, i32, i32) {
    %c0_i32 = arith.constant 0 : i32
    %c0_i32_0 = arith.constant 0 : i32
    %c0_i32_1 = arith.constant 0 : i32
    return %arg0, %c0_i32, %c0_i32_0 : i32, i32, i32
  }
  func.func @transform_1(%arg0: i32, %arg1: i32) -> (i32, i32) {
    %c0_i32 = arith.constant 0 : i32
    %c0_i32_0 = arith.constant 0 : i32
    return %c0_i32, %arg1 : i32, i32
  }
  func.func @transform_2(%arg0: i32, %arg1: i32) -> (i32, i32, i32) {
    %c0_i32 = arith.constant 0 : i32
    %c0_i32_0 = arith.constant 0 : i32
    return %arg0, %c0_i32, %arg1 : i32, i32, i32
  }
}

</mosaic_0001>

<bundles_post_ra>
// kernel: tpu_custom_call.1
= control target key start
LH: loop header
LB: loop body
LE: loop exit
PB: predicated region body
PF: predicated region fallthrough
CT: control target
= control target key end

     0   :  { %7 = vsyncpa [#allocation3], 0  ;;  %s5755_s0 = inlined_call_operand.vmem [shape: f32[1,49,1008], index: 0, kind: input, shape index: {}]   ;;  %s5756_s1 = inlined_call_operand.hbm [shape: bf16[1008,1024], index: 1, kind: input, shape index: {}]   ;;  %s5757_s2 = inlined_call_operand.vmem [shape: f32[1,49,1024], index: 2, kind: output, shape index: {}]  }
   0x1   :  { %9 = vsyncpa [#allocation3 + $0x1], 0  ;;  %s4412_s9 = smov 0   ;;  %s4414_s10 = smov 0  }
   0x2   :  { %s4416_s11 = smov 0   ;;  %s4418_s12 = smov 0  }
   0x3   :  { %s4420_s13 = smov 0   ;;  %s4422_s14 = smov 0  }
   0x4 LB: > { %s2961_s15 = sadd.s32 4294967295, %s4392_s14   ;;  %s24_s16 = sadd.s32 1, %s4388_s13  ;;  %s4392_s14 = sphi %s4422_s14, %s15_s14   ;;  %s4388_s13 = sphi %s4420_s13, %s5828_s13   ;;  %s4384_s12 = sphi %s4418_s12, %s5827_s12   ;;  %s4380_s11 = sphi %s4416_s11, %s5826_s11   ;;  %s4376_s10 = sphi %s4414_s10, %s5825_s10   ;;  %s4372_s9 = sphi %s4412_s9, %s5824_s9  }
   0x5   : > { %p25_p0 = scmp.ge.s32.totalorder %s24_s16, 2  ;;  %s60_s17 = sadd.s32 1, %s4380_s11 }
   0x6   : > { %p67_p1 = scmp.ne.s32.totalorder %s4380_s11, %s4376_s10  ;;  %p68_p2 = scmp.eq.s32.totalorder %s4392_s14, 0 }
   0x7   : > { %s5830_s16 = smov (%p25_p0, %s24_s16), 0  ;;  %p73_p4 = scmp.ne.s32.totalorder %s4376_s10, %s4372_s9 }
   0x8   : > { %p4448_p3 = por %p68_p2, %p67_p1  ;;  %s57_s19 = ssub.s32 %s4388_s13, %s5830_s16 }
   0x9   : > { %p74_p5 = scmp.eq.s32.totalorder %s2961_s15, 0  ;;  %p58_p6 = scmp.eq.s32.totalorder %s57_s19, 0 }
   0xa   : > { %p99_p7 = scmp.eq.s32.totalorder %s2961_s15, 1  ;;  %p4260_p10 = scmp.lt.s32.totalorder %s4392_s14, 2 }
   0xb   : > { %p4455_p8 = por %p74_p5, %p73_p4  ;;  %s133_s23 = sand.u32 1, %s4380_s11  }
   0xc   : > { %s4460_s21 = scalar_select %p58_p6, %s4380_s11, %s60_s17  }
   0xd   : > { %p4462_p9 = por %p99_p7, %p67_p1  ;;  %s3997_s24 = sshll.u32 %s4388_s13, 4 }
   0xe   : > { %s4251_s25 = smul.u32 2016, %s133_s23  ;;  %s142_s28 = scalar_lea.hbm %s5756_s1, %s3997_s24 }
   0xf   : > { %p4257_p11 = pnand %p4260_p10, %p4448_p3  ;;  %s143_s29 = sshll.u32 %s142_s28, 4  ;;  %s144_s29 = int_to_ptr.hbm [resolvable:$true] %s143_s29 }
  0x10   : > { %s137_s30 = scalar_lea.vmem [#allocation2], %s4251_s25  ;;  %p2968_p12 = scmp.ge.s32.totalorder %s4392_s14, 1 }
  0x11   : > { %s145_s3 = sshll.u32 %s137_s30, 4  ;;  %s134_s4 = scalar_lea.sflag [#allocation3], %s133_s23  ;;  %s146_s3 = int_to_ptr.vmem [resolvable:$true] %s145_s3 }
  0x12   : > { %s4394_s5 = smov 512   ;;  %s4395_s6 = smov 256  }
  0x13   : > { %s4396_s7 = smov 16   ;;  %p153_p13 = scmp.lt.s32.totalorder %s4392_s14, 3 }
  0x14   : > { %4259 = dma.hbm_to_vmem [thread:$0]  (!%p4257_p11), %s144_s29, 32256, %s146_s3, %s134_s4, %s4394_s5, %s4395_s6, %s4396_s7  }
  0x15   : > { %p154_p0 = pnand %p2968_p12, %p153_p13 }
  0x17   : > { %157 = sbr.rel (%p154_p0) target bundleno = 713 (0x2c9), region = 28 }
  0x1c   : > { %s4477_s8 = sand.u32 1, %s4376_s10  }
  0x1d   : > { %s4252_s9 = smul.u32 2016, %s4477_s8  ;;  %s160_s15 = scalar_lea.sflag [#allocation3], %s4477_s8 }
  0x1f   : > { %s4481_s17 = scalar_lea.vmem [#allocation2], %s4252_s9 }
  0x20   : > { %4367 = dma.done.wait (%p4455_p8), %s160_s15, 32256  }
  0x21   : > { %4369 = vsyncadd (%p4455_p8), %s160_s15, 4294935040  ;;  %v3083_v0 = vld [vmem:[%s4481_s17 + $0xe0] sm:$0xf]  ;;  %v4028_v1 = vld [vmem:[%s4481_s17 + $0xec] sm:$0xf0]  ;;  %vm1853_vm0 = vcmask 916480  }
  0x22   : > { %v3211_v2 = vld [vmem:[%s4481_s17 + $0x1e0] sm:$0xf]  ;;  %v3084_v3 = vor.u32 %v4028_v1, %v3083_v0  ;;  %v4060_v4 = vld [vmem:[%s4481_s17 + $0x1ec] sm:$0xf0]  ;;  %s4253_s24 = smul.u32 224, %s4477_s8  ;;  %s4250_s8 = sshll.u32 (%p4462_p9), %s4384_s12, 5 }
  0x23   : > { %v3339_v5 = vld [vmem:[%s4481_s17 + $0x2e0] sm:$0xf]  ;;  %v4092_v6 = vld [vmem:[%s4481_s17 + $0x2ec] sm:$0xf0]  ;;  %v3212_v7 = vor.u32 %v4060_v4, %v3211_v2  ;;  %s5681_s27 = scalar_lea.vmem (%p4462_p9), %s5757_s2, %s4250_s8 }
  0x24   : > { %v3340_v8 = vor.u32 %v4092_v6, %v3339_v5  ;;  %v3467_v9 = vld [vmem:[%s4481_s17 + $0x3e0] sm:$0xf]  ;;  %v4124_v10 = vld [vmem:[%s4481_s17 + $0x3ec] sm:$0xf0]  ;;  %1866 = vmatpush.bf16.msra.mxu0 %v3084_v3  ;;  %s5134_s25 = scalar_lea.vmem [#allocation4], %s4253_s24 }
  0x25   : > { %v3067_v11 = vld [vmem:[%s4481_s17 + $0xc0] sm:$0xf]  ;;  %v3468_v12 = vor.u32 %v4124_v10, %v3467_v9  ;;  %v4024_v13 = vld [vmem:[%s4481_s17 + $0xcc] sm:$0xf0]  ;;  %1894 = vmatpush.bf16.msra.mxu1 %v3212_v7 }
  0x26   : > { %v3195_v14 = vld [vmem:[%s4481_s17 + $0x1c0] sm:$0xf]  ;;  %v4056_v15 = vld [vmem:[%s4481_s17 + $0x1cc] sm:$0xf0]  ;;  %1922 = vmatpush.bf16.msra.mxu2 %v3340_v8  ;;  %v3068_v16 = vor.u32 %v4024_v13, %v3067_v11 }
  0x27   : > { %v3196_v17 = vor.u32 %v4056_v15, %v3195_v14  ;;  %v3323_v18 = vld [vmem:[%s4481_s17 + $0x2c0] sm:$0xf]  ;;  %v4088_v19 = vld [vmem:[%s4481_s17 + $0x2cc] sm:$0xf0]  ;;  %1950 = vmatpush.bf16.msra.mxu3 %v3468_v12 }
  0x28   : > { %v3451_v20 = vld [vmem:[%s4481_s17 + $0x3c0] sm:$0xf]  ;;  %v3324_v21 = vor.u32 %v4088_v19, %v3323_v18  ;;  %v4120_v22 = vld [vmem:[%s4481_s17 + $0x3cc] sm:$0xf0]  ;;  %1867 = vmatpush.bf16.msra.mxu0 %v3068_v16 }
  0x29   : > { %v3051_v23 = vld [vmem:[%s4481_s17 + $0xa0] sm:$0xf]  ;;  %v4020_v24 = vld [vmem:[%s4481_s17 + $0xac] sm:$0xf0]  ;;  %v3452_v25 = vor.u32 %v4120_v22, %v3451_v20  ;;  %1895 = vmatpush.bf16.msra.mxu1 %v3196_v17 }
  0x2a   : > { %v3179_v26 = vld [vmem:[%s4481_s17 + $0x1a0] sm:$0xf]  ;;  %v4052_v27 = vld [vmem:[%s4481_s17 + $0x1ac] sm:$0xf0]  ;;  %v3052_v29 = vor.u32 %v4020_v24, %v3051_v23  ;;  %1923 = vmatpush.bf16.msra.mxu2 %v3324_v21 }
  0x2b   : > { %v3307_v28 = vld [vmem:[%s4481_s17 + $0x2a0] sm:$0xf]  ;;  %v4084_v30 = vld [vmem:[%s4481_s17 + $0x2ac] sm:$0xf0]  ;;  %v3180_v33 = vor.u32 %v4052_v27, %v3179_v26  ;;  %1951 = vmatpush.bf16.msra.mxu3 %v3452_v25  ;;  %v198_v25 = vld [vmem:[%s5755_s0 + $0x8] sm:$0xff] }
  0x2c   : > { %v3435_v31 = vld [vmem:[%s4481_s17 + $0x3a0] sm:$0xf]  ;;  %v4116_v32 = vld [vmem:[%s4481_s17 + $0x3ac] sm:$0xf0]  ;;  %v3308_v34 = vor.u32 %v4084_v30, %v3307_v28  ;;  %1868 = vmatpush.bf16.msra.mxu0 %v3052_v29  ;;  %v206_v26 = vld [vmem:[%s5755_s0 + $0x48] sm:$0xff] }
  0x2d   : > { %v3035_v35 = vld [vmem:[%s4481_s17 + $0x80] sm:$0xf]  ;;  %v4016_v36 = vld [vmem:[%s4481_s17 + $0x8c] sm:$0xf0]  ;;  %v3436_v38 = vor.u32 %v4116_v32, %v3435_v31  ;;  %1896 = vmatpush.bf16.msra.mxu1 %v3180_v33 }
  0x2e   : > { %v3163_v37 = vld [vmem:[%s4481_s17 + $0x180] sm:$0xf]  ;;  %v4048_v39 = vld [vmem:[%s4481_s17 + $0x18c] sm:$0xf0]  ;;  %v3036_v44 = vor.u32 %v4016_v36, %v3035_v35  ;;  %1924 = vmatpush.bf16.msra.mxu2 %v3308_v34  ;;  %v200_v36 = vld [vmem:[%s5755_s0 + $0x18] sm:$0xff] }
  0x2f   : > { %v3291_v40 = vld [vmem:[%s4481_s17 + $0x280] sm:$0xf]  ;;  %v4080_v41 = vld [vmem:[%s4481_s17 + $0x28c] sm:$0xf0]  ;;  %v3164_v45 = vor.u32 %v4048_v39, %v3163_v37  ;;  %1952 = vmatpush.bf16.msra.mxu3 %v3436_v38  ;;  %v208_v37 = vld [vmem:[%s5755_s0 + $0x58] sm:$0xff]  ;;  %v254_v38 = vmax.f32 %v198_v25, 0.0 }
  0x30   : > { %v3419_v42 = vld [vmem:[%s4481_s17 + $0x380] sm:$0xf]  ;;  %v4112_v43 = vld [vmem:[%s4481_s17 + $0x38c] sm:$0xf0]  ;;  %v3292_v46 = vor.u32 %v4080_v41, %v3291_v40  ;;  %1869 = vmatpush.bf16.msra.mxu0 %v3036_v44  ;;  %v262_v39 = vmax.f32 %v206_v26, 0.0 }
  0x31   : > { %v3019_v47 = vld [vmem:[%s4481_s17 + $0x60] sm:$0xf]  ;;  %v4012_v48 = vld [vmem:[%s4481_s17 + $0x6c] sm:$0xf0]  ;;  %v3420_v50 = vor.u32 %v4112_v43, %v3419_v42  ;;  %1897 = vmatpush.bf16.msra.mxu1 %v3164_v45 }
  0x32   : > { %v3147_v49 = vld [vmem:[%s4481_s17 + $0x160] sm:$0xf]  ;;  %v4044_v51 = vld [vmem:[%s4481_s17 + $0x16c] sm:$0xf0]  ;;  %v3020_v56 = vor.u32 %v4012_v48, %v3019_v47  ;;  %1925 = vmatpush.bf16.msra.mxu2 %v3292_v46 }
  0x33   : > { %v3275_v52 = vld [vmem:[%s4481_s17 + $0x260] sm:$0xf]  ;;  %v4076_v53 = vld [vmem:[%s4481_s17 + $0x26c] sm:$0xf0]  ;;  %v3148_v57 = vor.u32 %v4044_v51, %v3147_v49  ;;  %1953 = vmatpush.bf16.msra.mxu3 %v3420_v50  ;;  %v256_v49 = vmax.f32 %v200_v36, 0.0  ;;  %v264_v50 = vmax.f32 %v208_v37, 0.0 }
  0x34   : > { %v3403_v54 = vld [vmem:[%s4481_s17 + $0x360] sm:$0xf]  ;;  %v4108_v55 = vld [vmem:[%s4481_s17 + $0x36c] sm:$0xf0]  ;;  %v3276_v58 = vor.u32 %v4076_v53, %v3275_v52  ;;  %1870 = vmatpush.bf16.msra.mxu0 %v3020_v56  ;;  %v216_v36 = vld [vmem:[%s5755_s0 + $0x98] sm:$0xff] }
  0x35   : > { %v3003_v59 = vld [vmem:[%s4481_s17 + $0x40] sm:$0xf]  ;;  %v4008_v60 = vld [vmem:[%s4481_s17 + $0x4c] sm:$0xf0]  ;;  %v3404_v62 = vor.u32 %v4108_v55, %v3403_v54  ;;  %1898 = vmatpush.bf16.msra.mxu1 %v3148_v57  ;;  %v224_v37 = vld [vmem:[%s5755_s0 + $0xd8] sm:$0xff] }
  0x36   : > { %v3131_v61 = vld [vmem:[%s4481_s17 + $0x140] sm:$0xf]  ;;  %v4040_v63 = vld [vmem:[%s4481_s17 + $0x14c] sm:$0xf0]  ;;  %v3004_v4 = vor.u32 %v4008_v60, %v3003_v59  ;;  %1926 = vmatpush.bf16.msra.mxu2 %v3276_v58 }
  0x37   : > { %v3259_v0 = vld [vmem:[%s4481_s17 + $0x240] sm:$0xf]  ;;  %v4072_v1 = vld [vmem:[%s4481_s17 + $0x24c] sm:$0xf0]  ;;  %v3132_v7 = vor.u32 %v4040_v63, %v3131_v61  ;;  %1954 = vmatpush.bf16.msra.mxu3 %v3404_v62  ;;  %v4587_v61 = vpack.c.bf16 %v262_v39, %v254_v38 }
  0x38   : > { %v3387_v2 = vld [vmem:[%s4481_s17 + $0x340] sm:$0xf]  ;;  %v4104_v3 = vld [vmem:[%s4481_s17 + $0x34c] sm:$0xf0]  ;;  %v3260_v8 = vor.u32 %v4072_v1, %v3259_v0  ;;  %1871 = vmatpush.bf16.msra.mxu0 %v3004_v4  ;;  %v4593_v1 = vpack.c.bf16 %v264_v50, %v256_v49 }
  0x39   : > { %v2987_v5 = vld [vmem:[%s4481_s17 + $0x20] sm:$0xf]  ;;  %v4004_v6 = vld [vmem:[%s4481_s17 + $0x2c] sm:$0xf0]  ;;  %v3388_v12 = vor.u32 %v4104_v3, %v3387_v2  ;;  %1899 = vmatpush.bf16.msra.mxu1 %v3132_v7 }
  0x3a   : > { %v3115_v9 = vld [vmem:[%s4481_s17 + $0x120] sm:$0xf]  ;;  %v4036_v10 = vld [vmem:[%s4481_s17 + $0x12c] sm:$0xf0]  ;;  %v2988_v20 = vor.u32 %v4004_v6, %v2987_v5  ;;  %1927 = vmatpush.bf16.msra.mxu2 %v3260_v8  ;;  %5786 = vst [vmem:[#allocation6_spill] sm:$0xff] %v4593_v1 }
  0x3b   : > { %v3243_v11 = vld [vmem:[%s4481_s17 + $0x220] sm:$0xf]  ;;  %v4068_v13 = vld [vmem:[%s4481_s17 + $0x22c] sm:$0xf0]  ;;  %v3116_v27 = vor.u32 %v4036_v10, %v3115_v9  ;;  %1955 = vmatpush.bf16.msra.mxu3 %v3388_v12 }
  0x3c   : > { %v3371_v14 = vld [vmem:[%s4481_s17 + $0x320] sm:$0xf]  ;;  %v4100_v15 = vld [vmem:[%s4481_s17 + $0x32c] sm:$0xf0]  ;;  %v3244_v28 = vor.u32 %v4068_v13, %v3243_v11  ;;  %1872 = vmatpush.bf16.msra.mxu0 %v2988_v20 }
  0x3d   : > { %v2971_v16 = vld [vmem:[%s4481_s17] sm:$0xf]  ;;  %v4000_v17 = vld [vmem:[%s4481_s17 + $0xc] sm:$0xf0]  ;;  %v3372_v32 = vor.u32 %v4100_v15, %v3371_v14  ;;  %1900 = vmatpush.bf16.msra.mxu1 %v3116_v27 }
  0x3e   : > { %v197_v18 = vld [vmem:[%s5755_s0] sm:$0xff]  ;;  %v4032_v22 = vld [vmem:[%s4481_s17 + $0x10c] sm:$0xf0]  ;;  %v2972_v42 = vor.u32 %v4000_v17, %v2971_v16  ;;  %1928 = vmatpush.bf16.msra.mxu2 %v3244_v28  ;;  %v214_v17 = vld [vmem:[%s5755_s0 + $0x88] sm:$0xff] }
  0x3f   : > { %v205_v19 = vld [vmem:[%s5755_s0 + $0x40] sm:$0xff]  ;;  %v4064_v24 = vld [vmem:[%s4481_s17 + $0x20c] sm:$0xf0]  ;;  %v253_v34 = vmax.f32 %v197_v18, 0.0  ;;  %1956 = vmatpush.bf16.msra.mxu3 %v3372_v32  ;;  %v222_v18 = vld [vmem:[%s5755_s0 + $0xc8] sm:$0xff] }
  0x40   : > { %v3099_v21 = vld [vmem:[%s4481_s17 + $0x100] sm:$0xf]  ;;  %v199_v30 = vld [vmem:[%s5755_s0 + $0x10] sm:$0xff]  ;;  %v261_v35 = vmax.f32 %v205_v19, 0.0  ;;  %1873 = vmatpush.bf16.msra.mxu0 %v2972_v42 }
  0x41   : > { %v3227_v23 = vld [vmem:[%s4481_s17 + $0x200] sm:$0xf]  ;;  %v207_v31 = vld [vmem:[%s5755_s0 + $0x50] sm:$0xff]  ;;  %v255_v43 = vmax.f32 %v199_v30, 0.0  ;;  %v3100_v47 = vor.u32 %v4032_v22, %v3099_v21 }
  0x42   : > { %v3355_v29 = vld [vmem:[%s4481_s17 + $0x300] sm:$0xf]  ;;  %v4096_v33 = vld [vmem:[%s4481_s17 + $0x30c] sm:$0xf0]  ;;  %v263_v44 = vmax.f32 %v207_v31, 0.0  ;;  %v3228_v48 = vor.u32 %v4064_v24, %v3227_v23  ;;  %v4582_v56 = vpack.c.bf16 %v261_v35, %v253_v34  ;;  %v278_v34 = vmax.f32 %v222_v18, 0.0 }
  0x43   : > { %v3851_v40 = vld [vmem:[%s4481_s17 + $0x6e0] sm:$0xf]  ;;  %v4220_v41 = vld [vmem:[%s4481_s17 + $0x6ec] sm:$0xf0]  ;;  %v3356_v51 = vor.u32 %v4096_v33, %v3355_v29  ;;  %1901 = vmatpush.bf16.msra.mxu1 %v3100_v47  ;;  %v270_v33 = vmax.f32 %v214_v17, 0.0 }
  0x44   : > { %v3963_v45 = vld [vmem:[%s4481_s17 + $0x7c0] sm:$0xf]  ;;  %v4248_v46 = vld [vmem:[%s4481_s17 + $0x7cc] sm:$0xf0]  ;;  %v3852_v52 = vor.u32 %v4220_v41, %v3851_v40  ;;  %v4589_v62 = vpack.c.bf16 %v263_v44, %v255_v43  ;;  %1929 = vmatpush.bf16.msra.mxu2 %v3228_v48  ;;  %1874 = vmatmul.bf16.vlgmr.msra.gmra.mxu0 %v4582_v56 }
  0x45   : > { %v3595_v53 = vld [vmem:[%s4481_s17 + $0x4e0] sm:$0xf]  ;;  %v4156_v54 = vld [vmem:[%s4481_s17 + $0x4ec] sm:$0xf0]  ;;  %v3964_v57 = vor.u32 %v4248_v46, %v3963_v45  ;;  %1957 = vmatpush.bf16.msra.mxu3 %v3356_v51 }
  0x46   : > { %v3723_v55 = vld [vmem:[%s4481_s17 + $0x5e0] sm:$0xf]  ;;  %v4188_v58 = vld [vmem:[%s4481_s17 + $0x5ec] sm:$0xf0]  ;;  %v3596_v2 = vor.u32 %v4156_v54, %v3595_v53  ;;  %1902 = vmatmul.bf16.vlgmr.msra.gmra.mxu1 %v4587_v61  ;;  %v280_v53 = vmax.f32 %v224_v37, 0.0 }
  0x47   : > { %v3835_v59 = vld [vmem:[%s4481_s17 + $0x6c0] sm:$0xf]  ;;  %v4216_v60 = vld [vmem:[%s4481_s17 + $0x6cc] sm:$0xf0]  ;;  %v3724_v3 = vor.u32 %v4188_v58, %v3723_v55  ;;  %1930 = vmatmul.bf16.vlgmr.msra.gmra.mxu2 %v4589_v62 }
  0x48   : > { %v3947_v63 = vld [vmem:[%s4481_s17 + $0x7a0] sm:$0xf]  ;;  %v4244_v0 = vld [vmem:[%s4481_s17 + $0x7ac] sm:$0xf0]  ;;  %2034 = vmatpush.bf16.msrb.mxu2 %v3852_v52  ;;  %v3836_v4 = vor.u32 %v4216_v60, %v3835_v59  ;;  %1958 = vmatmul.bf16.vlgmr.msra.gmra.mxu3 %v4593_v1  ;;  %v272_v52 = vmax.f32 %v216_v36, 0.0 }
  0x49   : > { %v3579_v5 = vld [vmem:[%s4481_s17 + $0x4c0] sm:$0xf]  ;;  %v4152_v6 = vld [vmem:[%s4481_s17 + $0x4cc] sm:$0xf0]  ;;  %2063 = vmatpush.bf16.msrb.mxu3 %v3964_v57  ;;  %v3948_v8 = vor.u32 %v4244_v0, %v3947_v63  ;;  %1978 = vmatpush.bf16.msrb.mxu0 %v3596_v2 }
  0x4a   : > { %v3707_v7 = vld [vmem:[%s4481_s17 + $0x5c0] sm:$0xf]  ;;  %v4184_v9 = vld [vmem:[%s4481_s17 + $0x5cc] sm:$0xf0]  ;;  %v3580_v15 = vor.u32 %v4152_v6, %v3579_v5  ;;  %2006 = vmatpush.bf16.msrb.mxu1 %v3724_v3  ;;  %v4655_v5 = vpack.c.bf16 %v278_v34, %v270_v33  ;;  %v238_v33 = vld [vmem:[%s5755_s0 + $0x148] sm:$0xff] }
  0x4b   : > { %v3819_v10 = vld [vmem:[%s4481_s17 + $0x6a0] sm:$0xf]  ;;  %v4212_v11 = vld [vmem:[%s4481_s17 + $0x6ac] sm:$0xf0]  ;;  %v3708_v19 = vor.u32 %v4184_v9, %v3707_v7  ;;  %v4661_v9 = vpack.c.bf16 %v280_v53, %v272_v52 }
  0x4c   : > { %v213_v12 = vld [vmem:[%s5755_s0 + $0x80] sm:$0xff]  ;;  %v4240_v14 = vld [vmem:[%s4481_s17 + $0x78c] sm:$0xf0]  ;;  %2035 = vmatpush.bf16.msrb.mxu2 %v3836_v4  ;;  %v3820_v20 = vor.u32 %v4212_v11, %v3819_v10  ;;  %5788 = vst [vmem:[#allocation8_spill] sm:$0xff] %v4655_v5 }
  0x4d   : > { %v3931_v13 = vld [vmem:[%s4481_s17 + $0x780] sm:$0xf]  ;;  %v4148_v22 = vld [vmem:[%s4481_s17 + $0x4ac] sm:$0xf0]  ;;  %2064 = vmatpush.bf16.msrb.mxu3 %v3948_v8  ;;  %v269_v28 = vmax.f32 %v213_v12, 0.0  ;;  %1979 = vmatpush.bf16.msrb.mxu0 %v3580_v15  ;;  %5790 = vst [vmem:[#allocation10_spill] sm:$0xff] %v4661_v9 }
  0x4e   : > { %v221_v16 = vld [vmem:[%s5755_s0 + $0xc0] sm:$0xff]  ;;  %v3932_v24 = vor.u32 %v4240_v14, %v3931_v13  ;;  %v4180_v25 = vld [vmem:[%s4481_s17 + $0x5ac] sm:$0xf0]  ;;  %2007 = vmatpush.bf16.msrb.mxu1 %v3708_v19 }
  0x4f   : > { %v3563_v21 = vld [vmem:[%s4481_s17 + $0x4a0] sm:$0xf]  ;;  %v4208_v27 = vld [vmem:[%s4481_s17 + $0x68c] sm:$0xf0]  ;;  %v277_v32 = vmax.f32 %v221_v16, 0.0 }
  0x50   : > { %v3691_v23 = vld [vmem:[%s4481_s17 + $0x5a0] sm:$0xf]  ;;  %v215_v29 = vld [vmem:[%s5755_s0 + $0x90] sm:$0xff]  ;;  %v3564_v38 = vor.u32 %v4148_v22, %v3563_v21  ;;  %2036 = vmatpush.bf16.msrb.mxu2 %v3820_v20 }
  0x51   : > { %v3803_v26 = vld [vmem:[%s4481_s17 + $0x680] sm:$0xf]  ;;  %v4236_v31 = vld [vmem:[%s4481_s17 + $0x76c] sm:$0xf0]  ;;  %v3692_v39 = vor.u32 %v4180_v25, %v3691_v23  ;;  %2065 = vmatpush.bf16.msrb.mxu3 %v3932_v24  ;;  %v271_v48 = vmax.f32 %v215_v29, 0.0  ;;  %v4650_v63 = vpack.c.bf16 %v277_v32, %v269_v28  ;;  %v230_v32 = vld [vmem:[%s5755_s0 + $0x108] sm:$0xff] }
  0x52   : > { %v3915_v30 = vld [vmem:[%s4481_s17 + $0x760] sm:$0xf]  ;;  %v223_v35 = vld [vmem:[%s5755_s0 + $0xd0] sm:$0xff]  ;;  %v3804_v40 = vor.u32 %v4208_v27, %v3803_v26  ;;  %1980 = vmatpush.bf16.msrb.mxu0 %v3564_v38  ;;  %v232_v38 = vld [vmem:[%s5755_s0 + $0x118] sm:$0xff] }
  0x53   : > { %v3547_v41 = vld [vmem:[%s4481_s17 + $0x480] sm:$0xf]  ;;  %v4144_v42 = vld [vmem:[%s4481_s17 + $0x48c] sm:$0xf0]  ;;  %v3916_v44 = vor.u32 %v4236_v31, %v3915_v30  ;;  %v279_v49 = vmax.f32 %v223_v35, 0.0  ;;  %2008 = vmatpush.bf16.msrb.mxu1 %v3692_v39  ;;  %5787 = vst [vmem:[#allocation7_spill] sm:$0xff] %v4650_v63 }
  0x54   : > { %v3675_v43 = vld [vmem:[%s4481_s17 + $0x580] sm:$0xf]  ;;  %v4176_v45 = vld [vmem:[%s4481_s17 + $0x58c] sm:$0xf0]  ;;  %v3548_v54 = vor.u32 %v4144_v42, %v3547_v41  ;;  %2037 = vmatpush.bf16.msrb.mxu2 %v3804_v40  ;;  %1879 = vmatmul.bf16.gmra.mxu0 %v4650_v63  ;;  %v240_v40 = vld [vmem:[%s5755_s0 + $0x158] sm:$0xff]  ;;  %v288_v53 = vmax.f32 %v232_v38, 0.0 }
  0x55   : > { %v3787_v46 = vld [vmem:[%s4481_s17 + $0x660] sm:$0xf]  ;;  %v4204_v47 = vld [vmem:[%s4481_s17 + $0x66c] sm:$0xf0]  ;;  %v3676_v55 = vor.u32 %v4176_v45, %v3675_v43  ;;  %2066 = vmatpush.bf16.msrb.mxu3 %v3916_v44  ;;  %v4657_v6 = vpack.c.bf16 %v279_v49, %v271_v48  ;;  %v286_v49 = vmax.f32 %v230_v32, 0.0 }
  0x56   : > { %v3899_v50 = vld [vmem:[%s4481_s17 + $0x740] sm:$0xf]  ;;  %v4232_v51 = vld [vmem:[%s4481_s17 + $0x74c] sm:$0xf0]  ;;  %v3788_v57 = vor.u32 %v4204_v47, %v3787_v46  ;;  %1981 = vmatpush.bf16.msrb.mxu0 %v3548_v54  ;;  %1907 = vmatmul.bf16.gmra.mxu1 %v4655_v5  ;;  %v296_v54 = vmax.f32 %v240_v40, 0.0 }
  0x57   : > { %v3531_v58 = vld [vmem:[%s4481_s17 + $0x460] sm:$0xf]  ;;  %v4140_v59 = vld [vmem:[%s4481_s17 + $0x46c] sm:$0xf0]  ;;  %v3900_v0 = vor.u32 %v4232_v51, %v3899_v50  ;;  %5789 = vst [vmem:[#allocation9_spill] sm:$0xff] %v4657_v6  ;;  %2009 = vmatpush.bf16.msrb.mxu1 %v3676_v55  ;;  %1935 = vmatmul.bf16.gmra.mxu2 %v4657_v6  ;;  %v294_v50 = vmax.f32 %v238_v33, 0.0 }
  0x58   : > { %v3659_v60 = vld [vmem:[%s4481_s17 + $0x560] sm:$0xf]  ;;  %v4172_v2 = vld [vmem:[%s4481_s17 + $0x56c] sm:$0xf0]  ;;  %v3532_v10 = vor.u32 %v4140_v59, %v3531_v58  ;;  %2038 = vmatpush.bf16.msrb.mxu2 %v3788_v57  ;;  %1963 = vmatmul.bf16.gmra.mxu3 %v4661_v9 }
  0x59   : > { %v3771_v3 = vld [vmem:[%s4481_s17 + $0x640] sm:$0xf]  ;;  %v4200_v4 = vld [vmem:[%s4481_s17 + $0x64c] sm:$0xf0]  ;;  %v3660_v11 = vor.u32 %v4172_v2, %v3659_v60  ;;  %2067 = vmatpush.bf16.msrb.mxu3 %v3900_v0  ;;  %v4711_v59 = vpack.c.bf16 %v294_v50, %v286_v49  ;;  %v4715_v0 = vpack.c.bf16 %v296_v54, %v288_v53  ;;  %v4090_v2 = vld [vmem:[%s4481_s17 + $0x2e4] sm:$0xf] }
  0x5a   : > { %v3883_v7 = vld [vmem:[%s4481_s17 + $0x720] sm:$0xf]  ;;  %v4228_v8 = vld [vmem:[%s4481_s17 + $0x72c] sm:$0xf0]  ;;  %v3772_v12 = vor.u32 %v4200_v4, %v3771_v3  ;;  %1982 = vmatpush.bf16.msrb.mxu0 %v3532_v10  ;;  %v3341_v3 = vld [vmem:[%s4481_s17 + $0x2f0] sm:$0xf0] }
  0x5b   : > { %v3515_v13 = vld [vmem:[%s4481_s17 + $0x440] sm:$0xf]  ;;  %v4136_v14 = vld [vmem:[%s4481_s17 + $0x44c] sm:$0xf0]  ;;  %v3884_v17 = vor.u32 %v4228_v8, %v3883_v7  ;;  %2010 = vmatpush.bf16.msrb.mxu1 %v3660_v11  ;;  %5792 = vst [vmem:[#allocation12_spill] sm:$0xff] %v4711_v59  ;;  %v3344_v8 = vor.u32 %v4090_v2, %v3341_v3  ;;  %v202_v50 = vld [vmem:[%s5755_s0 + $0x28] sm:$0xff] }
  0x5c   : > { %v3643_v15 = vld [vmem:[%s4481_s17 + $0x540] sm:$0xf]  ;;  %v4168_v16 = vld [vmem:[%s4481_s17 + $0x54c] sm:$0xf0]  ;;  %v3516_v18 = vor.u32 %v4136_v14, %v3515_v13  ;;  %2039 = vmatpush.bf16.msrb.mxu2 %v3772_v12  ;;  %5794 = vst [vmem:[#allocation14_spill] sm:$0xff] %v4715_v0 }
  0x5d   : > { %v3755_v19 = vld [vmem:[%s4481_s17 + $0x620] sm:$0xf]  ;;  %v4196_v20 = vld [vmem:[%s4481_s17 + $0x62c] sm:$0xf0]  ;;  %v3644_v24 = vor.u32 %v4168_v16, %v3643_v15  ;;  %2068 = vmatpush.bf16.msrb.mxu3 %v3884_v17  ;;  %v4122_v4 = vld [vmem:[%s4481_s17 + $0x3e4] sm:$0xf] }
  0x5e   : > { %v3499_v21 = vld [vmem:[%s4481_s17 + $0x420] sm:$0xf]  ;;  %v3756_v25 = vor.u32 %v4196_v20, %v3755_v19  ;;  %v4132_v26 = vld [vmem:[%s4481_s17 + $0x42c] sm:$0xf0]  ;;  %1983 = vmatpush.bf16.msrb.mxu0 %v3516_v18  ;;  %v3469_v10 = vld [vmem:[%s4481_s17 + $0x3f0] sm:$0xf0] }
  0x5f   : > { %v229_v22 = vld [vmem:[%s5755_s0 + $0x100] sm:$0xff]  ;;  %v4164_v28 = vld [vmem:[%s4481_s17 + $0x52c] sm:$0xf0]  ;;  %v3500_v39 = vor.u32 %v4132_v26, %v3499_v21  ;;  %2011 = vmatpush.bf16.msrb.mxu1 %v3644_v24  ;;  %v3085_v12 = vld [vmem:[%s4481_s17 + $0xf0] sm:$0xf0]  ;;  %v3472_v15 = vor.u32 %v4122_v4, %v3469_v10 }
  0x60   : > { %v237_v23 = vld [vmem:[%s5755_s0 + $0x140] sm:$0xff]  ;;  %v4224_v30 = vld [vmem:[%s4481_s17 + $0x70c] sm:$0xf0]  ;;  %2040 = vmatpush.bf16.msrb.mxu2 %v3756_v25  ;;  %v285_v45 = vmax.f32 %v229_v22, 0.0  ;;  %v246_v13 = vld [vmem:[%s5755_s0 + $0x188] sm:$0x1] }
  0x61   : > { %v3627_v27 = vld [vmem:[%s4481_s17 + $0x520] sm:$0xf]  ;;  %v4192_v35 = vld [vmem:[%s4481_s17 + $0x60c] sm:$0xf0]  ;;  %v293_v46 = vmax.f32 %v237_v23, 0.0 }
  0x62   : > { %v3867_v29 = vld [vmem:[%s4481_s17 + $0x700] sm:$0xf]  ;;  %v231_v36 = vld [vmem:[%s5755_s0 + $0x110] sm:$0xff]  ;;  %v3628_v41 = vor.u32 %v4164_v28, %v3627_v27  ;;  %1984 = vmatpush.bf16.msrb.mxu0 %v3500_v39  ;;  %v4026_v11 = vld [vmem:[%s4481_s17 + $0xe4] sm:$0xf] }
  0x63   : > { %v3739_v31 = vld [vmem:[%s4481_s17 + $0x600] sm:$0xf]  ;;  %v3868_v34 = vor.u32 %v4224_v30, %v3867_v29  ;;  %v239_v37 = vld [vmem:[%s5755_s0 + $0x150] sm:$0xff]  ;;  %v287_v51 = vmax.f32 %v231_v36, 0.0  ;;  %v4709_v58 = vpack.c.bf16 %v293_v46, %v285_v45  ;;  %v3088_v16 = vor.u32 %v4026_v11, %v3085_v12  ;;  %v4058_v17 = vld [vmem:[%s4481_s17 + $0x1e4] sm:$0xf] }
  0x64   : > { %v3740_v42 = vor.u32 %v4192_v35, %v3739_v31  ;;  %v3483_v43 = vld [vmem:[%s4481_s17 + $0x400] sm:$0xf]  ;;  %v4128_v44 = vld [vmem:[%s4481_s17 + $0x40c] sm:$0xf0]  ;;  %v295_v52 = vmax.f32 %v239_v37, 0.0  ;;  %2012 = vmatpush.bf16.msrb.mxu1 %v3628_v41 }
  0x65   : > { %2069 = vmatpush.bf16.msrb.mxu3 %v3868_v34  ;;  %v3611_v47 = vld [vmem:[%s4481_s17 + $0x500] sm:$0xf]  ;;  %v4160_v48 = vld [vmem:[%s4481_s17 + $0x50c] sm:$0xf0]  ;;  %v3484_v55 = vor.u32 %v4128_v44, %v3483_v43  ;;  %5791 = vst [vmem:[#allocation11_spill] sm:$0xff] %v4709_v58  ;;  %1884 = vmatmul.bf16.gmra.mxu0 %v4709_v58  ;;  %v302_v34 = vmax.f32 %v246_v13, 0.0 }
  0x66   : > { %2041 = vmatpush.bf16.msrb.mxu2 %v3740_v42  ;;  %v3612_v57 = vor.u32 %v4160_v48, %v3611_v47  ;;  %v4713_v60 = vpack.c.bf16 %v295_v52, %v287_v51  ;;  %1912 = vmatmul.bf16.gmra.mxu1 %v4711_v59  ;;  %v245_v7 = vld [vmem:[%s5755_s0 + $0x180] sm:$0x1]  ;;  %v247_v14 = vld [vmem:[%s5755_s0 + $0x190] sm:$0x1]  ;;  %v3213_v18 = vld [vmem:[%s4481_s17 + $0x1f0] sm:$0xf0] }
  0x67   : > { %1985 = vmatpush.bf16.msrb.mxu0 %v3484_v55  ;;  %v4086_v19 = vld [vmem:[%s4481_s17 + $0x2c4] sm:$0xf]  ;;  %v3216_v20 = vor.u32 %v4058_v17, %v3213_v18  ;;  %v3325_v21 = vld [vmem:[%s4481_s17 + $0x2d0] sm:$0xf0]  ;;  %v248_v29 = vld [vmem:[%s5755_s0 + $0x198] sm:$0x1]  ;;  %v4751_v38 = vpack.c.bf16 %v302_v34, %v302_v34 }
  0x68   : > { %5793 = vst [vmem:[#allocation13_spill] sm:$0xff] %v4713_v60  ;;  %2013 = vmatpush.bf16.msrb.mxu1 %v3612_v57  ;;  %1940 = vmatmul.bf16.gmra.mxu2 %v4713_v60  ;;  %v4118_v22 = vld [vmem:[%s4481_s17 + $0x3c4] sm:$0xf]  ;;  %v3453_v23 = vld [vmem:[%s4481_s17 + $0x3d0] sm:$0xf0]  ;;  %v3328_v24 = vor.u32 %v4086_v19, %v3325_v21  ;;  %v301_v32 = vmax.f32 %v245_v7, 0.0 }
  0x69   : > { %1968 = vmatmul.bf16.gmra.mxu3 %v4715_v0  ;;  %v3456_v25 = vor.u32 %v4118_v22, %v3453_v23  ;;  %v4022_v26 = vld [vmem:[%s4481_s17 + $0xc4] sm:$0xf]  ;;  %v3069_v27 = vld [vmem:[%s4481_s17 + $0xd0] sm:$0xf0]  ;;  %v303_v35 = vmax.f32 %v247_v14, 0.0  ;;  %v304_v36 = vmax.f32 %v248_v29, 0.0 }
  0x6a   : > { %2146 = vmatpush.bf16.msra.mxu2 %v3344_v8  ;;  %2174 = vmatpush.bf16.msra.mxu3 %v3472_v15  ;;  %v4054_v28 = vld [vmem:[%s4481_s17 + $0x1c4] sm:$0xf]  ;;  %v3072_v30 = vor.u32 %v4022_v26, %v3069_v27  ;;  %v3197_v31 = vld [vmem:[%s4481_s17 + $0x1d0] sm:$0xf0]  ;;  %v4749_v37 = vpack.c.bf16 %v301_v32, %v301_v32  ;;  %5796 = vst [vmem:[#allocation16_spill] sm:$0xff] %v4751_v38  ;;  %v210_v51 = vld [vmem:[%s5755_s0 + $0x68] sm:$0xff] }
  0x6b   : > { %2090 = vmatpush.bf16.msra.mxu0 %v3088_v16  ;;  %v3200_v33 = vor.u32 %v4054_v28, %v3197_v31  ;;  %v4753_v39 = vpack.c.bf16 %v303_v35, %v303_v35  ;;  %v4755_v40 = vpack.c.bf16 %v304_v36, %v304_v36  ;;  %v4082_v41 = vld [vmem:[%s4481_s17 + $0x2a4] sm:$0xf]  ;;  %v3309_v42 = vld [vmem:[%s4481_s17 + $0x2b0] sm:$0xf0]  ;;  %v204_v16 = vld [vmem:[%s5755_s0 + $0x38] sm:$0xff]  ;;  %v258_v23 = vmax.f32 %v202_v50, 0.0 }
  0x6c   : > { %2118 = vmatpush.bf16.msra.mxu1 %v3216_v20  ;;  %5795 = vst [vmem:[#allocation15_spill] sm:$0xff] %v4749_v37  ;;  %v4114_v43 = vld [vmem:[%s4481_s17 + $0x3a4] sm:$0xf]  ;;  %v3312_v46 = vor.u32 %v4082_v41, %v3309_v42  ;;  %v3437_v47 = vld [vmem:[%s4481_s17 + $0x3b0] sm:$0xf0]  ;;  %v212_v17 = vld [vmem:[%s5755_s0 + $0x78] sm:$0xff] }
  0x6d   : > { %5797 = vst [vmem:[#allocation17_spill] sm:$0xff] %v4753_v39  ;;  %v201_v44 = vld [vmem:[%s5755_s0 + $0x20] sm:$0xff]  ;;  %v3053_v49 = vld [vmem:[%s4481_s17 + $0xb0] sm:$0xf0]  ;;  %v3440_v54 = vor.u32 %v4114_v43, %v3437_v47  ;;  %v260_v27 = vmax.f32 %v204_v16, 0.0  ;;  %v268_v28 = vmax.f32 %v212_v17, 0.0 }
  0x6e   : > { %2147 = vmatpush.bf16.msra.mxu2 %v3328_v24  ;;  %2175 = vmatpush.bf16.msra.mxu3 %v3456_v25  ;;  %5798 = vst [vmem:[#allocation18_spill] sm:$0xff] %v4755_v40  ;;  %v209_v45 = vld [vmem:[%s5755_s0 + $0x60] sm:$0xff]  ;;  %v203_v52 = vld [vmem:[%s5755_s0 + $0x30] sm:$0xff]  ;;  %v257_v20 = vmax.f32 %v201_v44, 0.0  ;;  %v266_v24 = vmax.f32 %v210_v51, 0.0  ;;  %v226_v47 = vld [vmem:[%s5755_s0 + $0xe8] sm:$0xff] }
  0x6f   : > { %2091 = vmatpush.bf16.msra.mxu0 %v3072_v30  ;;  %v4018_v48 = vld [vmem:[%s4481_s17 + $0xa4] sm:$0xf]  ;;  %v211_v53 = vld [vmem:[%s5755_s0 + $0x70] sm:$0xff]  ;;  %v265_v21 = vmax.f32 %v209_v45, 0.0  ;;  %v259_v25 = vmax.f32 %v203_v52, 0.0  ;;  %v4807_v32 = vpack.c.bf16 %v268_v28, %v260_v27 }
  0x70   : > { %2119 = vmatpush.bf16.msra.mxu1 %v3200_v33  ;;  %v3056_v55 = vor.u32 %v4018_v48, %v3053_v49  ;;  %v4050_v57 = vld [vmem:[%s4481_s17 + $0x1a4] sm:$0xf]  ;;  %v3181_v2 = vld [vmem:[%s4481_s17 + $0x1b0] sm:$0xf0]  ;;  %v267_v26 = vmax.f32 %v211_v53, 0.0  ;;  %v4803_v30 = vpack.c.bf16 %v266_v24, %v258_v23 }
  0x71   : > { %v4078_v3 = vld [vmem:[%s4481_s17 + $0x284] sm:$0xf]  ;;  %v3184_v4 = vor.u32 %v4050_v57, %v3181_v2  ;;  %v3293_v7 = vld [vmem:[%s4481_s17 + $0x290] sm:$0xf0]  ;;  %v4801_v29 = vpack.c.bf16 %v265_v21, %v257_v20  ;;  %v282_v20 = vmax.f32 %v226_v47, 0.0 }
  0x72   : > { %2148 = vmatpush.bf16.msra.mxu2 %v3312_v46  ;;  %v4110_v8 = vld [vmem:[%s4481_s17 + $0x384] sm:$0xf]  ;;  %v3421_v10 = vld [vmem:[%s4481_s17 + $0x390] sm:$0xf0]  ;;  %2176 = vmatpush.bf16.msra.mxu3 %v3440_v54  ;;  %v3296_v11 = vor.u32 %v4078_v3, %v3293_v7  ;;  %v4805_v31 = vpack.c.bf16 %v267_v26, %v259_v25  ;;  %v218_v46 = vld [vmem:[%s5755_s0 + $0xa8] sm:$0xff] }
  0x73   : > { %2092 = vmatpush.bf16.msra.mxu0 %v3056_v55  ;;  %v3424_v12 = vor.u32 %v4110_v8, %v3421_v10  ;;  %v4014_v13 = vld [vmem:[%s4481_s17 + $0x84] sm:$0xf]  ;;  %v3037_v14 = vld [vmem:[%s4481_s17 + $0x90] sm:$0xf0] }
  0x74   : > { %v4046_v15 = vld [vmem:[%s4481_s17 + $0x184] sm:$0xf]  ;;  %2120 = vmatpush.bf16.msra.mxu1 %v3184_v4  ;;  %v3040_v18 = vor.u32 %v4014_v13, %v3037_v14  ;;  %v3165_v19 = vld [vmem:[%s4481_s17 + $0x190] sm:$0xf0]  ;;  %v228_v13 = vld [vmem:[%s5755_s0 + $0xf8] sm:$0xff] }
  0x75   : > { %1889 = vmatmul.bf16.gmra.mxu0 %v4749_v37  ;;  %v3168_v22 = vor.u32 %v4046_v15, %v3165_v19  ;;  %v4074_v33 = vld [vmem:[%s4481_s17 + $0x264] sm:$0xf]  ;;  %v3277_v34 = vld [vmem:[%s4481_s17 + $0x270] sm:$0xf0]  ;;  %v274_v19 = vmax.f32 %v218_v46, 0.0  ;;  %v284_v24 = vmax.f32 %v228_v13, 0.0 }
  0x76   : > { %1917 = vmatmul.bf16.gmra.mxu1 %v4751_v38  ;;  %2149 = vmatpush.bf16.msra.mxu2 %v3296_v11  ;;  %v4106_v35 = vld [vmem:[%s4481_s17 + $0x364] sm:$0xf]  ;;  %v3280_v42 = vor.u32 %v4074_v33, %v3277_v34  ;;  %v3405_v43 = vld [vmem:[%s4481_s17 + $0x370] sm:$0xf0]  ;;  %v234_v46 = vld [vmem:[%s5755_s0 + $0x128] sm:$0xff] }
  0x77   : > { %2177 = vmatpush.bf16.msra.mxu3 %v3424_v12  ;;  %2093 = vmatpush.bf16.msra.mxu0 %v3040_v18  ;;  %v217_v36 = vld [vmem:[%s5755_s0 + $0xa0] sm:$0xff]  ;;  %v3021_v45 = vld [vmem:[%s4481_s17 + $0x70] sm:$0xf0]  ;;  %v3408_v50 = vor.u32 %v4106_v35, %v3405_v43  ;;  %v220_v12 = vld [vmem:[%s5755_s0 + $0xb8] sm:$0xff]  ;;  %v4856_v26 = vpack.c.bf16 %v282_v20, %v274_v19  ;;  %v290_v13 = vmax.f32 %v234_v46, 0.0 }
  0x78   : > { %1945 = vmatmul.bf16.gmra.mxu2 %v4753_v39  ;;  %2121 = vmatpush.bf16.msra.mxu1 %v3168_v22  ;;  %v225_v41 = vld [vmem:[%s5755_s0 + $0xe0] sm:$0xff]  ;;  %v219_v48 = vld [vmem:[%s5755_s0 + $0xb0] sm:$0xff]  ;;  %v273_v16 = vmax.f32 %v217_v36, 0.0  ;;  %v276_v23 = vmax.f32 %v220_v12, 0.0 }
  0x79   : > { %1973 = vmatmul.bf16.gmra.mxu3 %v4755_v40  ;;  %v4010_v44 = vld [vmem:[%s4481_s17 + $0x64] sm:$0xf]  ;;  %v227_v49 = vld [vmem:[%s5755_s0 + $0xf0] sm:$0xff]  ;;  %v281_v17 = vmax.f32 %v225_v41, 0.0  ;;  %v275_v21 = vmax.f32 %v219_v48, 0.0 }
  0x7a   : > { %v3024_v51 = vor.u32 %v4010_v44, %v3021_v45  ;;  %v4042_v52 = vld [vmem:[%s4481_s17 + $0x164] sm:$0xf]  ;;  %v3149_v53 = vld [vmem:[%s4481_s17 + $0x170] sm:$0xf0]  ;;  %2150 = vmatpush.bf16.msra.mxu2 %v3280_v42  ;;  %v283_v22 = vmax.f32 %v227_v49, 0.0  ;;  %v4860_v28 = vpack.c.bf16 %v284_v24, %v276_v23 }
  0x7b   : > { %v4070_v54 = vld [vmem:[%s4481_s17 + $0x244] sm:$0xf]  ;;  %v3152_v55 = vor.u32 %v4042_v52, %v3149_v53  ;;  %v3261_v57 = vld [vmem:[%s4481_s17 + $0x250] sm:$0xf0]  ;;  %2178 = vmatpush.bf16.msra.mxu3 %v3408_v50  ;;  %v4854_v25 = vpack.c.bf16 %v281_v17, %v273_v16 }
  0x7c   : > { %v4102_v2 = vld [vmem:[%s4481_s17 + $0x344] sm:$0xf]  ;;  %v3389_v3 = vld [vmem:[%s4481_s17 + $0x350] sm:$0xf0]  ;;  %2094 = vmatpush.bf16.msra.mxu0 %v3024_v51  ;;  %v3264_v4 = vor.u32 %v4070_v54, %v3261_v57  ;;  %v4858_v27 = vpack.c.bf16 %v283_v22, %v275_v21  ;;  %v242_v57 = vld [vmem:[%s5755_s0 + $0x168] sm:$0xff] }
  0x7d   : > { %v3392_v7 = vor.u32 %v4102_v2, %v3389_v3  ;;  %v4006_v8 = vld [vmem:[%s4481_s17 + $0x44] sm:$0xf]  ;;  %v3005_v10 = vld [vmem:[%s4481_s17 + $0x50] sm:$0xf0]  ;;  %2122 = vmatpush.bf16.msra.mxu1 %v3152_v55 }
  0x7e   : > { %v4038_v11 = vld [vmem:[%s4481_s17 + $0x144] sm:$0xf]  ;;  %v3008_v14 = vor.u32 %v4006_v8, %v3005_v10  ;;  %v3133_v15 = vld [vmem:[%s4481_s17 + $0x150] sm:$0xf0]  ;;  %2151 = vmatpush.bf16.msra.mxu2 %v3264_v4  ;;  %v236_v8 = vld [vmem:[%s5755_s0 + $0x138] sm:$0xff] }
  0x7f   : > { %v3136_v18 = vor.u32 %v4038_v11, %v3133_v15  ;;  %2179 = vmatpush.bf16.msra.mxu3 %v3392_v7  ;;  %v4066_v33 = vld [vmem:[%s4481_s17 + $0x224] sm:$0xf]  ;;  %v3245_v34 = vld [vmem:[%s4481_s17 + $0x230] sm:$0xf0]  ;;  %v244_v10 = vld [vmem:[%s5755_s0 + $0x178] sm:$0xff]  ;;  %v292_v17 = vmax.f32 %v236_v8, 0.0 }
  0x80   : > { %2095 = vmatpush.bf16.msra.mxu0 %v3008_v14  ;;  %v4098_v35 = vld [vmem:[%s4481_s17 + $0x324] sm:$0xf]  ;;  %v3248_v42 = vor.u32 %v4066_v33, %v3245_v34  ;;  %v3373_v43 = vld [vmem:[%s4481_s17 + $0x330] sm:$0xf0]  ;;  %v298_v14 = vmax.f32 %v242_v57, 0.0 }
  0x81   : > { %2123 = vmatpush.bf16.msra.mxu1 %v3136_v18  ;;  %v233_v36 = vld [vmem:[%s5755_s0 + $0x120] sm:$0xff]  ;;  %v2989_v45 = vld [vmem:[%s4481_s17 + $0x30] sm:$0xf0]  ;;  %v3376_v47 = vor.u32 %v4098_v35, %v3373_v43  ;;  %v300_v18 = vmax.f32 %v244_v10, 0.0 }
  0x82   : > { %v241_v41 = vld [vmem:[%s5755_s0 + $0x160] sm:$0xff]  ;;  %v3117_v50 = vld [vmem:[%s4481_s17 + $0x130] sm:$0xf0]  ;;  %2152 = vmatpush.bf16.msra.mxu2 %v3248_v42  ;;  %v289_v11 = vmax.f32 %v233_v36, 0.0  ;;  %v4908_v23 = vpack.c.bf16 %v298_v14, %v290_v13 }
  0x83   : > { %v4002_v44 = vld [vmem:[%s4481_s17 + $0x24] sm:$0xf]  ;;  %v3229_v53 = vld [vmem:[%s4481_s17 + $0x210] sm:$0xf0]  ;;  %2180 = vmatpush.bf16.msra.mxu3 %v3376_v47  ;;  %v297_v12 = vmax.f32 %v241_v41, 0.0  ;;  %v4913_v35 = vpack.c.bf16 %v300_v18, %v292_v17 }
  0x84   : > { %v2992_v48 = vor.u32 %v4002_v44, %v2989_v45  ;;  %v4034_v49 = vld [vmem:[%s4481_s17 + $0x124] sm:$0xf]  ;;  %v3357_v55 = vld [vmem:[%s4481_s17 + $0x310] sm:$0xf0]  ;;  %v249_v41 = vld [vmem:[%s5755_s0 + $0x1a0] sm:$0x1] }
  0x85   : > { %1986 = vmatmul.bf16.vlgmr.msrb.gmra.mxu0 %v4801_v29  ;;  %v4062_v51 = vld [vmem:[%s4481_s17 + $0x204] sm:$0xf]  ;;  %v3120_v52 = vor.u32 %v4034_v49, %v3117_v50  ;;  %v235_v2 = vld [vmem:[%s5755_s0 + $0x130] sm:$0xff]  ;;  %v4903_v19 = vpack.c.bf16 %v297_v12, %v289_v11  ;;  %v250_v49 = vld [vmem:[%s5755_s0 + $0x1a8] sm:$0x1] }
  0x86   : > { %2014 = vmatmul.bf16.vlgmr.msrb.gmra.mxu1 %v4803_v30  ;;  %v4094_v54 = vld [vmem:[%s4481_s17 + $0x304] sm:$0xf]  ;;  %v243_v3 = vld [vmem:[%s5755_s0 + $0x170] sm:$0xff]  ;;  %2096 = vmatpush.bf16.msra.mxu0 %v2992_v48  ;;  %v3232_v4 = vor.u32 %v4062_v51, %v3229_v53  ;;  %v291_v15 = vmax.f32 %v235_v2, 0.0  ;;  %v305_v48 = vmax.f32 %v249_v41, 0.0 }
  0x87   : > { %v3360_v7 = vor.u32 %v4094_v54, %v3357_v55  ;;  %2124 = vmatpush.bf16.msra.mxu1 %v3120_v52  ;;  %v299_v16 = vmax.f32 %v243_v3, 0.0  ;;  %v3998_v20 = vld [vmem:[%s4481_s17 + $0x4] sm:$0xf]  ;;  %v2973_v21 = vld [vmem:[%s4481_s17 + $0x10] sm:$0xf0] }
  0x88   : > { %2042 = vmatmul.bf16.vlgmr.msrb.gmra.mxu2 %v4805_v31  ;;  %v4030_v22 = vld [vmem:[%s4481_s17 + $0x104] sm:$0xf]  ;;  %v2976_v33 = vor.u32 %v3998_v20, %v2973_v21  ;;  %v3101_v34 = vld [vmem:[%s4481_s17 + $0x110] sm:$0xf0]  ;;  %v251_v50 = vld [vmem:[%s5755_s0 + $0x1b0] sm:$0x1] }
  0x89   : > { %3977 = vmatmul.msk.bf16.vlgmr.msrb.gmra.mxu3 %vm1853_vm0, %v4807_v32  ;;  %2153 = vmatpush.bf16.msra.mxu2 %v3232_v4  ;;  %v4910_v24 = vpack.c.bf16 %v299_v16, %v291_v15  ;;  %v3104_v36 = vor.u32 %v4030_v22, %v3101_v34  ;;  %v4218_v42 = vld [vmem:[%s4481_s17 + $0x6e4] sm:$0xf]  ;;  %v3853_v43 = vld [vmem:[%s4481_s17 + $0x6f0] sm:$0xf0]  ;;  %v252_v51 = vld [vmem:[%s5755_s0 + $0x1b8] sm:$0x1]  ;;  %v4944_v15 = vpack.c.bf16 %v305_v48, %v305_v48 }
  0x8a   : > { %2181 = vmatpush.bf16.msra.mxu3 %v3360_v7  ;;  %2097 = vmatpush.bf16.msra.mxu0 %v2976_v33  ;;  %v4246_v44 = vld [vmem:[%s4481_s17 + $0x7c4] sm:$0xf]  ;;  %v3856_v45 = vor.u32 %v4218_v42, %v3853_v43  ;;  %v3965_v46 = vld [vmem:[%s4481_s17 + $0x7d0] sm:$0xf0]  ;;  %v306_v4 = vmax.f32 %v250_v49, 0.0  ;;  %v307_v7 = vmax.f32 %v251_v50, 0.0 }
  0x8b   : > { %2125 = vmatpush.bf16.msra.mxu1 %v3104_v36  ;;  %v3968_v47 = vor.u32 %v4246_v44, %v3965_v46  ;;  %v4154_v52 = vld [vmem:[%s4481_s17 + $0x4e4] sm:$0xf]  ;;  %v3597_v53 = vld [vmem:[%s4481_s17 + $0x4f0] sm:$0xf0]  ;;  %v308_v13 = vmax.f32 %v252_v51, 0.0 }
  0x8c   : > { %v4186_v54 = vld [vmem:[%s4481_s17 + $0x5e4] sm:$0xf]  ;;  %v3600_v55 = vor.u32 %v4154_v52, %v3597_v53  ;;  %v3725_v57 = vld [vmem:[%s4481_s17 + $0x5f0] sm:$0xf0]  ;;  %v4946_v16 = vpack.c.bf16 %v306_v4, %v306_v4  ;;  %v4948_v17 = vpack.c.bf16 %v307_v7, %v307_v7 }
  0x8d   : > { %2258 = vmatpush.bf16.msrb.mxu2 %v3856_v45  ;;  %v4214_v2 = vld [vmem:[%s4481_s17 + $0x6c4] sm:$0xf]  ;;  %v3837_v3 = vld [vmem:[%s4481_s17 + $0x6d0] sm:$0xf0]  ;;  %v3728_v8 = vor.u32 %v4186_v54, %v3725_v57  ;;  %v4950_v18 = vpack.c.bf16 %v308_v13, %v308_v13 }
  0x8e   : > { %2287 = vmatpush.bf16.msrb.mxu3 %v3968_v47  ;;  %v3840_v10 = vor.u32 %v4214_v2, %v3837_v3  ;;  %v4242_v11 = vld [vmem:[%s4481_s17 + $0x7a4] sm:$0xf]  ;;  %v3949_v12 = vld [vmem:[%s4481_s17 + $0x7b0] sm:$0xf0]  ;;  %2202 = vmatpush.bf16.msrb.mxu0 %v3600_v55 }
  0x8f   : > { %v3952_v14 = vor.u32 %v4242_v11, %v3949_v12  ;;  %2230 = vmatpush.bf16.msrb.mxu1 %v3728_v8  ;;  %v4150_v20 = vld [vmem:[%s4481_s17 + $0x4c4] sm:$0xf]  ;;  %v3581_v21 = vld [vmem:[%s4481_s17 + $0x4d0] sm:$0xf0] }
  0x90   : > { %v4182_v22 = vld [vmem:[%s4481_s17 + $0x5c4] sm:$0xf]  ;;  %v3584_v33 = vor.u32 %v4150_v20, %v3581_v21  ;;  %v3709_v34 = vld [vmem:[%s4481_s17 + $0x5d0] sm:$0xf0] }
  0x91   : > { %2259 = vmatpush.bf16.msrb.mxu2 %v3840_v10  ;;  %v3712_v36 = vor.u32 %v4182_v22, %v3709_v34  ;;  %v4210_v41 = vld [vmem:[%s4481_s17 + $0x6a4] sm:$0xf]  ;;  %v3821_v42 = vld [vmem:[%s4481_s17 + $0x6b0] sm:$0xf0] }
  0x92   : > { %2288 = vmatpush.bf16.msrb.mxu3 %v3952_v14  ;;  %2203 = vmatpush.bf16.msrb.mxu0 %v3584_v33  ;;  %v3824_v43 = vor.u32 %v4210_v41, %v3821_v42  ;;  %v4238_v44 = vld [vmem:[%s4481_s17 + $0x784] sm:$0xf]  ;;  %v3933_v45 = vld [vmem:[%s4481_s17 + $0x790] sm:$0xf0] }
  0x93   : > { %2231 = vmatpush.bf16.msrb.mxu1 %v3712_v36  ;;  %v4146_v46 = vld [vmem:[%s4481_s17 + $0x4a4] sm:$0xf]  ;;  %v3936_v47 = vor.u32 %v4238_v44, %v3933_v45  ;;  %v3565_v48 = vld [vmem:[%s4481_s17 + $0x4b0] sm:$0xf0] }
  0x94   : > { %v4178_v49 = vld [vmem:[%s4481_s17 + $0x5a4] sm:$0xf]  ;;  %v3693_v50 = vld [vmem:[%s4481_s17 + $0x5b0] sm:$0xf0]  ;;  %v3568_v51 = vor.u32 %v4146_v46, %v3565_v48 }
  0x95   : > { %1991 = vmatmul.bf16.gmra.mxu0 %v4854_v25  ;;  %2260 = vmatpush.bf16.msrb.mxu2 %v3824_v43  ;;  %v3696_v52 = vor.u32 %v4178_v49, %v3693_v50  ;;  %v4206_v53 = vld [vmem:[%s4481_s17 + $0x684] sm:$0xf]  ;;  %v3805_v54 = vld [vmem:[%s4481_s17 + $0x690] sm:$0xf0] }
  0x96   : > { %2019 = vmatmul.bf16.gmra.mxu1 %v4856_v26  ;;  %2289 = vmatpush.bf16.msrb.mxu3 %v3936_v47  ;;  %v3808_v55 = vor.u32 %v4206_v53, %v3805_v54  ;;  %v4234_v3 = vld [vmem:[%s4481_s17 + $0x764] sm:$0xf]  ;;  %v3917_v4 = vld [vmem:[%s4481_s17 + $0x770] sm:$0xf0] }
  0x97   : > { %2204 = vmatpush.bf16.msrb.mxu0 %v3568_v51  ;;  %2232 = vmatpush.bf16.msrb.mxu1 %v3696_v52  ;;  %v4142_v7 = vld [vmem:[%s4481_s17 + $0x484] sm:$0xf]  ;;  %v3920_v8 = vor.u32 %v4234_v3, %v3917_v4  ;;  %v3549_v10 = vld [vmem:[%s4481_s17 + $0x490] sm:$0xf0] }
  0x98   : > { %2047 = vmatmul.bf16.gmra.mxu2 %v4858_v27  ;;  %v4174_v11 = vld [vmem:[%s4481_s17 + $0x584] sm:$0xf]  ;;  %v3677_v12 = vld [vmem:[%s4481_s17 + $0x590] sm:$0xf0]  ;;  %v3552_v13 = vor.u32 %v4142_v7, %v3549_v10 }
  0x99   : > { %3978 = vmatmul.msk.bf16.gmra.mxu3 %vm1853_vm0, %v4860_v28  ;;  %2261 = vmatpush.bf16.msrb.mxu2 %v3808_v55  ;;  %v3680_v14 = vor.u32 %v4174_v11, %v3677_v12  ;;  %v4202_v20 = vld [vmem:[%s4481_s17 + $0x664] sm:$0xf]  ;;  %v3789_v21 = vld [vmem:[%s4481_s17 + $0x670] sm:$0xf0] }
  0x9a   : > { %2290 = vmatpush.bf16.msrb.mxu3 %v3920_v8  ;;  %v3792_v22 = vor.u32 %v4202_v20, %v3789_v21  ;;  %v4138_v42 = vld [vmem:[%s4481_s17 + $0x464] sm:$0xf]  ;;  %v3533_v43 = vld [vmem:[%s4481_s17 + $0x470] sm:$0xf0] }
  0x9b   : > { %2205 = vmatpush.bf16.msrb.mxu0 %v3552_v13  ;;  %2233 = vmatpush.bf16.msrb.mxu1 %v3680_v14  ;;  %v4230_v44 = vld [vmem:[%s4481_s17 + $0x744] sm:$0xf]  ;;  %v3536_v45 = vor.u32 %v4138_v42, %v3533_v43  ;;  %v3901_v46 = vld [vmem:[%s4481_s17 + $0x750] sm:$0xf0] }
  0x9c   : > { %v4170_v47 = vld [vmem:[%s4481_s17 + $0x564] sm:$0xf]  ;;  %v3661_v48 = vld [vmem:[%s4481_s17 + $0x570] sm:$0xf0]  ;;  %v3904_v49 = vor.u32 %v4230_v44, %v3901_v46 }
  0x9d   : > { %2262 = vmatpush.bf16.msrb.mxu2 %v3792_v22  ;;  %v3664_v50 = vor.u32 %v4170_v47, %v3661_v48  ;;  %v4198_v51 = vld [vmem:[%s4481_s17 + $0x644] sm:$0xf]  ;;  %v3773_v52 = vld [vmem:[%s4481_s17 + $0x650] sm:$0xf0] }
  0x9e   : > { %v3776_v53 = vor.u32 %v4198_v51, %v3773_v52  ;;  %2291 = vmatpush.bf16.msrb.mxu3 %v3904_v49  ;;  %v4134_v7 = vld [vmem:[%s4481_s17 + $0x444] sm:$0xf]  ;;  %v3517_v8 = vld [vmem:[%s4481_s17 + $0x450] sm:$0xf0] }
  0x9f   : > { %2206 = vmatpush.bf16.msrb.mxu0 %v3536_v45  ;;  %2234 = vmatpush.bf16.msrb.mxu1 %v3664_v50  ;;  %v4166_v10 = vld [vmem:[%s4481_s17 + $0x544] sm:$0xf]  ;;  %v3520_v11 = vor.u32 %v4134_v7, %v3517_v8  ;;  %v3645_v12 = vld [vmem:[%s4481_s17 + $0x550] sm:$0xf0] }
  0xa0   : > { %v4226_v13 = vld [vmem:[%s4481_s17 + $0x724] sm:$0xf]  ;;  %v3885_v14 = vld [vmem:[%s4481_s17 + $0x730] sm:$0xf0]  ;;  %v3648_v20 = vor.u32 %v4166_v10, %v3645_v12 }
  0xa1   : > { %2263 = vmatpush.bf16.msrb.mxu2 %v3776_v53  ;;  %v3888_v21 = vor.u32 %v4226_v13, %v3885_v14  ;;  %v4194_v22 = vld [vmem:[%s4481_s17 + $0x624] sm:$0xf]  ;;  %v3757_v42 = vld [vmem:[%s4481_s17 + $0x630] sm:$0xf0] }
  0xa2   : > { %v3760_v43 = vor.u32 %v4194_v22, %v3757_v42  ;;  %v4130_v48 = vld [vmem:[%s4481_s17 + $0x424] sm:$0xf]  ;;  %v3501_v49 = vld [vmem:[%s4481_s17 + $0x430] sm:$0xf0] }
  0xa3   : > { %2207 = vmatpush.bf16.msrb.mxu0 %v3520_v11  ;;  %2235 = vmatpush.bf16.msrb.mxu1 %v3648_v20  ;;  %v4162_v50 = vld [vmem:[%s4481_s17 + $0x524] sm:$0xf]  ;;  %v3504_v51 = vor.u32 %v4130_v48, %v3501_v49  ;;  %v3629_v52 = vld [vmem:[%s4481_s17 + $0x530] sm:$0xf0] }
  0xa4   : > { %2292 = vmatpush.bf16.msrb.mxu3 %v3888_v21  ;;  %v4222_v53 = vld [vmem:[%s4481_s17 + $0x704] sm:$0xf]  ;;  %v3869_v7 = vld [vmem:[%s4481_s17 + $0x710] sm:$0xf0]  ;;  %v3632_v8 = vor.u32 %v4162_v50, %v3629_v52  ;;  %v3347_v52 = vld [vmem:[%s4481_s17 + $0x2e8] sm:$0xf] }
  0xa5   : > { %1996 = vmatmul.bf16.gmra.mxu0 %v4903_v19  ;;  %2264 = vmatpush.bf16.msrb.mxu2 %v3760_v43  ;;  %v3872_v10 = vor.u32 %v4222_v53, %v3869_v7  ;;  %v4190_v11 = vld [vmem:[%s4481_s17 + $0x604] sm:$0xf]  ;;  %v3741_v12 = vld [vmem:[%s4481_s17 + $0x610] sm:$0xf0]  ;;  %v4093_v53 = vld [vmem:[%s4481_s17 + $0x2f4] sm:$0xf0] }
  0xa6   : > { %2024 = vmatmul.bf16.gmra.mxu1 %v4908_v23  ;;  %v3744_v13 = vor.u32 %v4190_v11, %v3741_v12  ;;  %v4126_v20 = vld [vmem:[%s4481_s17 + $0x404] sm:$0xf]  ;;  %v3485_v21 = vld [vmem:[%s4481_s17 + $0x410] sm:$0xf0]  ;;  %v3475_v7 = vld [vmem:[%s4481_s17 + $0x3e8] sm:$0xf] }
  0xa7   : > { %2208 = vmatpush.bf16.msrb.mxu0 %v3504_v51  ;;  %2236 = vmatpush.bf16.msrb.mxu1 %v3632_v8  ;;  %v4158_v22 = vld [vmem:[%s4481_s17 + $0x504] sm:$0xf]  ;;  %v3488_v48 = vor.u32 %v4126_v20, %v3485_v21  ;;  %v3613_v49 = vld [vmem:[%s4481_s17 + $0x510] sm:$0xf0]  ;;  %v3348_v8 = vor.u32 %v4093_v53, %v3347_v52  ;;  %v3331_v52 = vld [vmem:[%s4481_s17 + $0x2c8] sm:$0xf] }
  0xa8   : > { %2052 = vmatmul.bf16.gmra.mxu2 %v4910_v24  ;;  %2293 = vmatpush.bf16.msrb.mxu3 %v3872_v10  ;;  %v3616_v51 = vor.u32 %v4158_v22, %v3613_v49  ;;  %v4125_v10 = vld [vmem:[%s4481_s17 + $0x3f4] sm:$0xf0]  ;;  %v3091_v22 = vld [vmem:[%s4481_s17 + $0xe8] sm:$0xf] }
  0xa9   : > { %3979 = vmatmul.msk.bf16.gmra.mxu3 %vm1853_vm0, %v4913_v35  ;;  %2265 = vmatpush.bf16.msrb.mxu2 %v3744_v13  ;;  %v3476_v12 = vor.u32 %v4125_v10, %v3475_v7  ;;  %v3219_v49 = vld [vmem:[%s4481_s17 + $0x1e8] sm:$0xf]  ;;  %v4089_v53 = vld [vmem:[%s4481_s17 + $0x2d4] sm:$0xf0] }
  0xaa   : > { %v3459_v7 = vld [vmem:[%s4481_s17 + $0x3c8] sm:$0xf]  ;;  %v4121_v10 = vld [vmem:[%s4481_s17 + $0x3d4] sm:$0xf0] }
  0xab   : > { %2209 = vmatpush.bf16.msrb.mxu0 %v3488_v48  ;;  %2237 = vmatpush.bf16.msrb.mxu1 %v3616_v51  ;;  %v4029_v48 = vld [vmem:[%s4481_s17 + $0xf4] sm:$0xf0] }
  0xac   : > { %v3092_v51 = vor.u32 %v4029_v48, %v3091_v22  ;;  %v3075_v48 = vld [vmem:[%s4481_s17 + $0xc8] sm:$0xf] }
  0xb5   : > { %2001 = vmatmul.bf16.gmra.mxu0 %v4944_v15 }
  0xb6   : > { %2029 = vmatmul.bf16.gmra.mxu1 %v4946_v16 }
  0xb8   : > { %2057 = vmatmul.bf16.gmra.mxu2 %v4948_v17 }
  0xb9   : > { %3980 = vmatmul.msk.bf16.gmra.mxu3 %vm1853_vm0, %v4950_v18 }
  0xc1   : > { %v4971_v57 = vpop.f32.mrf.mxu0 }
  0xc3   : > { %v4973_v2 = vpop.f32.mrf.mxu1 }
  0xc5   : > { %2098 = vmatmul.bf16.vlgmr.msra.gmra.mxu0 %v4582_v56 }
  0xc6   : > { %2126 = vmatmul.bf16.vlgmr.msra.gmra.mxu1 %v4587_v61  ;;  %2314 = vmatpush.bf16.msra.mxu0 %v3092_v51  ;;  %v3203_v51 = vld [vmem:[%s4481_s17 + $0x1c8] sm:$0xf] }
  0xc8   : > { %2154 = vmatmul.bf16.vlgmr.msra.gmra.mxu2 %v4589_v62 }
  0xc9   : > { %2182 = vmatmul.bf16.vlgmr.msra.gmra.mxu3 %v4593_v1  ;;  %v4991_v36 = vpop.f32.mrf.mxu0  ;;  %2370 = vmatpush.bf16.msra.mxu2 %v3348_v8  ;;  %v3460_v8 = vor.u32 %v4121_v10, %v3459_v7 }
  0xca   : > { %v4987_v33 = vpop.f32.mrf.mxu2  ;;  %2398 = vmatpush.bf16.msra.mxu3 %v3476_v12 }
  0xcb   : > { %v4989_v34 = vpop.f32.mrf.mxu3  ;;  %v4993_v41 = vpop.f32.mrf.mxu1 }
  0xce   : > { %2399 = vmatpush.bf16.msra.mxu3 %v3460_v8  ;;  %v3443_v8 = vld [vmem:[%s4481_s17 + $0x3a8] sm:$0xf] }
  0xd1   : > { %v5007_v3 = vpop.f32.mrf.mxu0 }
  0xd2   : > { %v5003_v54 = vpop.f32.mrf.mxu2 }
  0xd3   : > { %v5005_v55 = vpop.f32.mrf.mxu3  ;;  %v5009_v4 = vpop.f32.mrf.mxu1 }
  0xd5   : > { %2103 = vmatmul.bf16.gmra.mxu0 %v4650_v63  ;;  %v4113_v63 = vld [vmem:[%s4481_s17 + $0x394] sm:$0xf0] }
  0xd6   : > { %2131 = vmatmul.bf16.gmra.mxu1 %v4655_v5 }
  0xd8   : > { %2159 = vmatmul.bf16.gmra.mxu2 %v4657_v6  ;;  %v4053_v6 = vld [vmem:[%s4481_s17 + $0x1b4] sm:$0xf0] }
  0xd9   : > { %2187 = vmatmul.bf16.gmra.mxu3 %v4661_v9  ;;  %v5027_v46 = vpop.f32.mrf.mxu0  ;;  %v3187_v9 = vld [vmem:[%s4481_s17 + $0x1a8] sm:$0xf] }
  0xda   : > { %v5023_v44 = vpop.f32.mrf.mxu2  ;;  %v3188_v5 = vor.u32 %v4053_v6, %v3187_v9  ;;  %v1906_v6 = vadd.f32 %v4993_v41, %v4991_v36  ;;  %v4049_v36 = vld [vmem:[%s4481_s17 + $0x194] sm:$0xf0]  ;;  %v3283_v41 = vld [vmem:[%s4481_s17 + $0x268] sm:$0xf] }
  0xdb   : > { %v5025_v45 = vpop.f32.mrf.mxu3  ;;  %v5029_v47 = vpop.f32.mrf.mxu1 }
  0xe2   : > { %v5039_v14 = vpop.f32.mrf.mxu2  ;;  %v5046_v43 = vpop.f32.mrf.mxu0 }
  0xe3   : > { %v5044_v42 = vpop.f32.mrf.mxu3  ;;  %v5049_v50 = vpop.f32.mrf.mxu1 }
  0xe5   : > { %2108 = vmatmul.bf16.gmra.mxu0 %v4709_v58 }
  0xe6   : > { %2136 = vmatmul.bf16.gmra.mxu1 %v4711_v59  ;;  %v3332_v59 = vor.u32 %v4089_v53, %v3331_v52  ;;  %v4057_v53 = vld [vmem:[%s4481_s17 + $0x1d4] sm:$0xf0] }
  0xe7   : > { %v3204_v7 = vor.u32 %v4057_v53, %v3203_v51 }
  0xe8   : > { %2164 = vmatmul.bf16.gmra.mxu2 %v4713_v60 }
  0xe9   : > { %2192 = vmatmul.bf16.gmra.mxu3 %v4715_v0  ;;  %v4061_v0 = vld [vmem:[%s4481_s17 + $0x1f4] sm:$0xf0]  ;;  %2371 = vmatpush.bf16.msra.mxu2 %v3332_v59 }
  0xea   : > { %v5063_v20 = vpop.f32.mrf.mxu0  ;;  %v3220_v60 = vor.u32 %v4061_v0, %v3219_v49  ;;  %v4025_v49 = vld [vmem:[%s4481_s17 + $0xd4] sm:$0xf0] }
  0xeb   : > { %v5059_v11 = vpop.f32.mrf.mxu2  ;;  %v5065_v21 = vpop.f32.mrf.mxu1  ;;  %v3076_v52 = vor.u32 %v4025_v49, %v3075_v48  ;;  %v4085_v59 = vld [vmem:[%s4481_s17 + $0x2b4] sm:$0xf0]  ;;  %v1904_v48 = vadd.f32 %v4973_v2, %v4971_v57  ;;  %v3427_v2 = vld [vmem:[%s4481_s17 + $0x388] sm:$0xf] }
  0xec   : > { %v5061_v13 = vpop.f32.mrf.mxu3  ;;  %2342 = vmatpush.bf16.msra.mxu1 %v3220_v60  ;;  %v3315_v60 = vld [vmem:[%s4481_s17 + $0x2a8] sm:$0xf] }
  0xed   : > { %v3316_v10 = vor.u32 %v4085_v59, %v3315_v60  ;;  %2315 = vmatpush.bf16.msra.mxu0 %v3076_v52  ;;  %v1932_v53 = vadd.f32 %v4987_v33, %v1904_v48  ;;  %v3059_v60 = vld [vmem:[%s4481_s17 + $0xa8] sm:$0xf]  ;;  %v4021_v59 = vld [vmem:[%s4481_s17 + $0xb4] sm:$0xf0] }
  0xee   : > { %v3060_v52 = vor.u32 %v4021_v59, %v3059_v60  ;;  %v4077_v60 = vld [vmem:[%s4481_s17 + $0x274] sm:$0xf0] }
  0xef   : > { %2372 = vmatpush.bf16.msra.mxu2 %v3316_v10 }
  0xf0   : > { %2343 = vmatpush.bf16.msra.mxu1 %v3204_v7  ;;  %v3428_v7 = vor.u32 %v4113_v63, %v3427_v2  ;;  %v1934_v63 = vadd.f32 %v5003_v54, %v1906_v6 }
  0xf1   : > { %2316 = vmatpush.bf16.msra.mxu0 %v3060_v52 }
  0xf2   : > { %v5079_v22 = vpop.f32.mrf.mxu0 }
  0xf3   : > { %v5075_v58 = vpop.f32.mrf.mxu2  ;;  %v5081_v0 = vpop.f32.mrf.mxu1 }
  0xf4   : > { %v5077_v12 = vpop.f32.mrf.mxu3  ;;  %2344 = vmatpush.bf16.msra.mxu1 %v3188_v5  ;;  %v3043_v5 = vld [vmem:[%s4481_s17 + $0x88] sm:$0xf] }
  0xf5   : > { %2113 = vmatmul.bf16.gmra.mxu0 %v4749_v37  ;;  %v4117_v37 = vld [vmem:[%s4481_s17 + $0x3b4] sm:$0xf0] }
  0xf6   : > { %2141 = vmatmul.bf16.gmra.mxu1 %v4751_v38 }
  0xf8   : > { %2169 = vmatmul.bf16.gmra.mxu2 %v4753_v39  ;;  %v3444_v39 = vor.u32 %v4117_v37, %v3443_v8  ;;  %v3299_v37 = vld [vmem:[%s4481_s17 + $0x288] sm:$0xf]  ;;  %v4081_v8 = vld [vmem:[%s4481_s17 + $0x294] sm:$0xf0] }
  0xf9   : > { %2197 = vmatmul.bf16.gmra.mxu3 %v4755_v40  ;;  %v3300_v57 = vor.u32 %v4081_v8, %v3299_v37  ;;  %v3284_v37 = vor.u32 %v4077_v60, %v3283_v41  ;;  %v3411_v8 = vld [vmem:[%s4481_s17 + $0x368] sm:$0xf] }
  0xfa   : > { %v1892_v40 = vpop.f32.mrf.mxu0  ;;  %2400 = vmatpush.bf16.msra.mxu3 %v3444_v39  ;;  %v1960_v39 = vadd.f32 %v4989_v34, %v1932_v53  ;;  %v4017_v34 = vld [vmem:[%s4481_s17 + $0x94] sm:$0xf0] }
  0xfb   : > { %v5095_v38 = vpop.f32.mrf.mxu2  ;;  %v1920_v51 = vpop.f32.mrf.mxu1  ;;  %2373 = vmatpush.bf16.msra.mxu2 %v3300_v57  ;;  %v3044_v53 = vor.u32 %v4017_v34, %v3043_v5  ;;  %v4109_v57 = vld [vmem:[%s4481_s17 + $0x374] sm:$0xf0] }
  0xfc   : > { %v5099_v49 = vpop.f32.mrf.mxu3  ;;  %v3171_v51 = vld [vmem:[%s4481_s17 + $0x188] sm:$0xf]  ;;  %v3412_v2 = vor.u32 %v4109_v57, %v3411_v8  ;;  %v4045_v34 = vld [vmem:[%s4481_s17 + $0x174] sm:$0xf0] }
  0xfd   : > { %v3172_v52 = vor.u32 %v4049_v36, %v3171_v51  ;;  %2317 = vmatpush.bf16.msra.mxu0 %v3044_v53  ;;  %v3267_v51 = vld [vmem:[%s4481_s17 + $0x248] sm:$0xf]  ;;  %v4073_v53 = vld [vmem:[%s4481_s17 + $0x254] sm:$0xf0] }
  0xfe   : > { %2401 = vmatpush.bf16.msra.mxu3 %v3428_v7  ;;  %v1909_v7 = vadd.f32 %v5009_v4, %v5007_v3  ;;  %v3027_v3 = vld [vmem:[%s4481_s17 + $0x68] sm:$0xf]  ;;  %v4013_v4 = vld [vmem:[%s4481_s17 + $0x74] sm:$0xf0]  ;;  %v3268_v60 = vor.u32 %v4073_v53, %v3267_v51 }
  0xff   : > { %2345 = vmatpush.bf16.msra.mxu1 %v3172_v52  ;;  %2374 = vmatpush.bf16.msra.mxu2 %v3284_v37  ;;  %v3028_v5 = vor.u32 %v4013_v4, %v3027_v3  ;;  %v4105_v52 = vld [vmem:[%s4481_s17 + $0x354] sm:$0xf0] }
 0x100   : > { %v4069_v4 = vld [vmem:[%s4481_s17 + $0x234] sm:$0xf0] }
 0x101   : > { %2318 = vmatpush.bf16.msra.mxu0 %v3028_v5  ;;  %v4101_v5 = vld [vmem:[%s4481_s17 + $0x334] sm:$0xf0] }
 0x102   : > { %v1987_v10 = vpop.f32.mrf.mxu0  ;;  %2402 = vmatpush.bf16.msra.mxu3 %v3412_v2 }
 0x103   : > { %v1948_v40 = vpop.f32.mrf.mxu2  ;;  %v2015_v48 = vpop.f32.mrf.mxu1  ;;  %v1988_v9 = vadd.f32 %v1987_v10, %v1960_v39  ;;  %2375 = vmatpush.bf16.msra.mxu2 %v3268_v60 }
 0x104   : > { %v1976_v33 = vpop.f32.mrf.mxu3  ;;  %v1962_v40 = vadd.f32 %v5005_v55, %v1934_v63  ;;  %v1937_v55 = vadd.f32 %v5023_v44, %v1909_v7  ;;  %v3155_v63 = vld [vmem:[%s4481_s17 + $0x168] sm:$0xf]  ;;  %v1911_v7 = vadd.f32 %v5029_v47, %v5027_v46 }
 0x105   : > { %2210 = vmatmul.bf16.vlgmr.msrb.gmra.mxu0 %v4801_v29  ;;  %v2016_v59 = vadd.f32 %v2015_v48, %v1988_v9  ;;  %v3156_v41 = vor.u32 %v4045_v34, %v3155_v63  ;;  %v3139_v47 = vld [vmem:[%s4481_s17 + $0x148] sm:$0xf] }
 0x106   : > { %2238 = vmatmul.bf16.vlgmr.msrb.gmra.mxu1 %v4803_v30  ;;  %v1965_v8 = vadd.f32 %v5025_v45, %v1937_v55  ;;  %v1939_v45 = vadd.f32 %v5039_v14, %v1911_v7  ;;  %v3379_v63 = vld [vmem:[%s4481_s17 + $0x328] sm:$0xf]  ;;  %v4065_v7 = vld [vmem:[%s4481_s17 + $0x214] sm:$0xf0] }
 0x107   : > { %2346 = vmatpush.bf16.msra.mxu1 %v3156_v41  ;;  %v3380_v51 = vor.u32 %v4101_v5, %v3379_v63  ;;  %v4033_v5 = vld [vmem:[%s4481_s17 + $0x114] sm:$0xf0] }
 0x108   : > { %2266 = vmatmul.bf16.vlgmr.msrb.gmra.mxu2 %v4805_v31  ;;  %v1967_v53 = vadd.f32 %v5044_v42, %v1939_v45  ;;  %v3123_v42 = vld [vmem:[%s4481_s17 + $0x128] sm:$0xf] }
 0x109   : > { %3981 = vmatmul.msk.bf16.vlgmr.msrb.gmra.mxu3 %vm1853_vm0, %v4807_v32 }
 0x10a   : > { %v1989_v10 = vpop.f32.mrf.mxu0 }
 0x10b   : > { %v2043_v54 = vpop.f32.mrf.mxu2  ;;  %v2017_v48 = vpop.f32.mrf.mxu1  ;;  %v1990_v9 = vadd.f32 %v1989_v10, %v1962_v40  ;;  %v3011_v10 = vld [vmem:[%s4481_s17 + $0x48] sm:$0xf] }
 0x10c   : > { %v2044_v39 = vadd.f32 %v2043_v54, %v2016_v59  ;;  %v2071_v33 = vpop.f32.mrf.mxu3  ;;  %v3395_v59 = vld [vmem:[%s4481_s17 + $0x348] sm:$0xf] }
 0x10d   : > { %v2018_v36 = vadd.f32 %v2017_v48, %v1990_v9  ;;  %v3396_v44 = vor.u32 %v4105_v52, %v3395_v59  ;;  %v4009_v48 = vld [vmem:[%s4481_s17 + $0x54] sm:$0xf0]  ;;  %v3251_v9 = vld [vmem:[%s4481_s17 + $0x228] sm:$0xf] }
 0x10e   : > { %v2072_v6 = vadd.f32 %v2071_v33, %v2044_v39  ;;  %v3012_v46 = vor.u32 %v4009_v48, %v3011_v10  ;;  %v3252_v34 = vor.u32 %v4069_v4, %v3251_v9 }
 0x10f   : > { %2403 = vmatpush.bf16.msra.mxu3 %v3396_v44 }
 0x110   : > { %2762 = vst [vmem:[%s5134_s25] sm:$0xff] %v2072_v6  ;;  %v4041_v6 = vld [vmem:[%s4481_s17 + $0x154] sm:$0xf0]  ;;  %2319 = vmatpush.bf16.msra.mxu0 %v3012_v46  ;;  %2376 = vmatpush.bf16.msra.mxu2 %v3252_v34 }
 0x111   : > { %v3140_v3 = vor.u32 %v4041_v6, %v3139_v47  ;;  %v2979_v47 = vld [vmem:[%s4481_s17 + $0x8] sm:$0xf]  ;;  %v4001_v6 = vld [vmem:[%s4481_s17 + $0x14] sm:$0xf0] }
 0x112   : > { %v1992_v2 = vpop.f32.mrf.mxu0  ;;  %v2980_v63 = vor.u32 %v4001_v6, %v2979_v47  ;;  %v4245_v47 = vld [vmem:[%s4481_s17 + $0x7b4] sm:$0xf0] }
 0x113   : > { %v2045_v37 = vpop.f32.mrf.mxu2  ;;  %v2020_v40 = vpop.f32.mrf.mxu1  ;;  %v1993_v33 = vadd.f32 %v1992_v2, %v1965_v8  ;;  %2347 = vmatpush.bf16.msra.mxu1 %v3140_v3  ;;  %2404 = vmatpush.bf16.msra.mxu3 %v3380_v51  ;;  %v2995_v8 = vld [vmem:[%s4481_s17 + $0x28] sm:$0xf]  ;;  %v1916_v51 = vadd.f32 %v5065_v21, %v5063_v20 }
 0x114   : > { %v2046_v57 = vadd.f32 %v2045_v37, %v2018_v36  ;;  %v2073_v54 = vpop.f32.mrf.mxu3  ;;  %v1914_v36 = vadd.f32 %v5049_v50, %v5046_v43  ;;  %v3235_v2 = vld [vmem:[%s4481_s17 + $0x208] sm:$0xf] }
 0x115   : > { %2215 = vmatmul.bf16.gmra.mxu0 %v4854_v25  ;;  %v2021_v55 = vadd.f32 %v2020_v40, %v1993_v33  ;;  %v4097_v33 = vld [vmem:[%s4481_s17 + $0x314] sm:$0xf0]  ;;  %v3236_v10 = vor.u32 %v4065_v7, %v3235_v2  ;;  %v3971_v20 = vld [vmem:[%s4481_s17 + $0x7c8] sm:$0xf] }
 0x116   : > { %v2074_v39 = vadd.f32 %v2073_v54, %v2046_v57  ;;  %2243 = vmatmul.bf16.gmra.mxu1 %v4856_v26  ;;  %v4005_v57 = vld [vmem:[%s4481_s17 + $0x34] sm:$0xf0]  ;;  %v1942_v43 = vadd.f32 %v5059_v11, %v1914_v36  ;;  %v3107_v11 = vld [vmem:[%s4481_s17 + $0x108] sm:$0xf] }
 0x117   : > { %v2996_v50 = vor.u32 %v4005_v57, %v2995_v8  ;;  %v4037_v54 = vld [vmem:[%s4481_s17 + $0x134] sm:$0xf0]  ;;  %2377 = vmatpush.bf16.msra.mxu2 %v3236_v10  ;;  %v3108_v34 = vor.u32 %v4033_v5, %v3107_v11  ;;  %v1919_v8 = vadd.f32 %v5081_v0, %v5079_v22 }
 0x118   : > { %2766 = vst [vmem:[%s5134_s25 + $0x20] sm:$0xff] %v2074_v39  ;;  %2271 = vmatmul.bf16.gmra.mxu2 %v4858_v27  ;;  %v3124_v40 = vor.u32 %v4037_v54, %v3123_v42  ;;  %v3363_v39 = vld [vmem:[%s4481_s17 + $0x308] sm:$0xf]  ;;  %v1970_v9 = vadd.f32 %v5061_v13, %v1942_v43  ;;  %v1944_v13 = vadd.f32 %v5075_v58, %v1916_v51  ;;  %v4157_v7 = vld [vmem:[%s4481_s17 + $0x4f4] sm:$0xf0] }
 0x119   : > { %3982 = vmatmul.msk.bf16.gmra.mxu3 %vm1853_vm0, %v4860_v28  ;;  %2320 = vmatpush.bf16.msra.mxu0 %v2996_v50  ;;  %v3364_v48 = vor.u32 %v4097_v33, %v3363_v39  ;;  %v3731_v39 = vld [vmem:[%s4481_s17 + $0x5e8] sm:$0xf]  ;;  %v4217_v10 = vld [vmem:[%s4481_s17 + $0x6d4] sm:$0xf0]  ;;  %v1947_v22 = vadd.f32 %v5095_v38, %v1919_v8 }
 0x11a   : > { %v1994_v59 = vpop.f32.mrf.mxu0  ;;  %2348 = vmatpush.bf16.msra.mxu1 %v3124_v40  ;;  %v3603_v40 = vld [vmem:[%s4481_s17 + $0x4e8] sm:$0xf]  ;;  %v4153_v51 = vld [vmem:[%s4481_s17 + $0x4d4] sm:$0xf0] }
 0x11b   : > { %v2048_v14 = vpop.f32.mrf.mxu2  ;;  %v2022_v52 = vpop.f32.mrf.mxu1  ;;  %v1995_v44 = vadd.f32 %v1994_v59, %v1967_v53  ;;  %2405 = vmatpush.bf16.msra.mxu3 %v3364_v48  ;;  %v3604_v33 = vor.u32 %v4157_v7, %v3603_v40  ;;  %v4181_v40 = vld [vmem:[%s4481_s17 + $0x5b4] sm:$0xf0] }
 0x11c   : > { %v2049_v41 = vadd.f32 %v2048_v14, %v2021_v55  ;;  %v2076_v60 = vpop.f32.mrf.mxu3 }
 0x11d   : > { %v2023_v45 = vadd.f32 %v2022_v52, %v1995_v44  ;;  %2321 = vmatpush.bf16.msra.mxu0 %v2980_v63  ;;  %v4249_v52 = vld [vmem:[%s4481_s17 + $0x7d4] sm:$0xf0]  ;;  %v1972_v44 = vadd.f32 %v5077_v12, %v1944_v13 }
 0x11e   : > { %v2077_v37 = vadd.f32 %v2076_v60, %v2049_v41  ;;  %2349 = vmatpush.bf16.msra.mxu1 %v3108_v34  ;;  %v3859_v41 = vld [vmem:[%s4481_s17 + $0x6e8] sm:$0xf]  ;;  %v4221_v60 = vld [vmem:[%s4481_s17 + $0x6f4] sm:$0xf0]  ;;  %v3972_v58 = vor.u32 %v4249_v52, %v3971_v20 }
 0x11f   : > { %v3860_v59 = vor.u32 %v4221_v60, %v3859_v41  ;;  %v4189_v12 = vld [vmem:[%s4481_s17 + $0x5f4] sm:$0xf0]  ;;  %v3587_v34 = vld [vmem:[%s4481_s17 + $0x4c8] sm:$0xf] }
 0x120   : > { %2770 = vst [vmem:[%s5134_s25 + $0x40] sm:$0xff] %v2077_v37  ;;  %2511 = vmatpush.bf16.msrb.mxu3 %v3972_v58  ;;  %v3732_v0 = vor.u32 %v4189_v12, %v3731_v39  ;;  %v4185_v13 = vld [vmem:[%s4481_s17 + $0x5d4] sm:$0xf0]  ;;  %v3827_v41 = vld [vmem:[%s4481_s17 + $0x6a8] sm:$0xf] }
 0x121   : > { %2482 = vmatpush.bf16.msrb.mxu2 %v3860_v59  ;;  %2426 = vmatpush.bf16.msrb.mxu0 %v3604_v33  ;;  %v4213_v60 = vld [vmem:[%s4481_s17 + $0x6b4] sm:$0xf0]  ;;  %v3811_v33 = vld [vmem:[%s4481_s17 + $0x688] sm:$0xf] }
 0x122   : > { %v1997_v4 = vpop.f32.mrf.mxu0  ;;  %2454 = vmatpush.bf16.msrb.mxu1 %v3732_v0  ;;  %v4209_v12 = vld [vmem:[%s4481_s17 + $0x694] sm:$0xf0] }
 0x123   : > { %v2050_v46 = vpop.f32.mrf.mxu2  ;;  %v2025_v14 = vpop.f32.mrf.mxu1  ;;  %v1998_v36 = vadd.f32 %v1997_v4, %v1970_v9 }
 0x124   : > { %v2051_v55 = vadd.f32 %v2050_v46, %v2023_v45  ;;  %v2078_v3 = vpop.f32.mrf.mxu3  ;;  %v3843_v45 = vld [vmem:[%s4481_s17 + $0x6c8] sm:$0xf] }
 0x125   : > { %2220 = vmatmul.bf16.gmra.mxu0 %v4903_v19  ;;  %v2026_v21 = vadd.f32 %v2025_v14, %v1998_v36  ;;  %v3844_v48 = vor.u32 %v4217_v10, %v3843_v45  ;;  %v3955_v46 = vld [vmem:[%s4481_s17 + $0x7a8] sm:$0xf]  ;;  %v3588_v36 = vor.u32 %v4153_v51, %v3587_v34  ;;  %v3812_v45 = vor.u32 %v4209_v12, %v3811_v33  ;;  %v4169_v33 = vld [vmem:[%s4481_s17 + $0x554] sm:$0xf0] }
 0x126   : > { %v2079_v53 = vadd.f32 %v2078_v3, %v2051_v55  ;;  %2248 = vmatmul.bf16.gmra.mxu1 %v4908_v23  ;;  %v3956_v6 = vor.u32 %v4245_v47, %v3955_v46  ;;  %v1975_v55 = vadd.f32 %v5099_v49, %v1947_v22  ;;  %v3923_v46 = vld [vmem:[%s4481_s17 + $0x768] sm:$0xf]  ;;  %v4237_v47 = vld [vmem:[%s4481_s17 + $0x774] sm:$0xf0] }
 0x127   : > { %2483 = vmatpush.bf16.msrb.mxu2 %v3844_v48  ;;  %2427 = vmatpush.bf16.msrb.mxu0 %v3588_v36  ;;  %v3891_v12 = vld [vmem:[%s4481_s17 + $0x728] sm:$0xf] }
 0x128   : > { %2774 = vst [vmem:[%s5134_s25 + $0x60] sm:$0xff] %v2079_v53  ;;  %2276 = vmatmul.bf16.gmra.mxu2 %v4910_v24  ;;  %2512 = vmatpush.bf16.msrb.mxu3 %v3956_v6  ;;  %v3715_v53 = vld [vmem:[%s4481_s17 + $0x5c8] sm:$0xf] }
 0x129   : > { %3983 = vmatmul.msk.bf16.gmra.mxu3 %vm1853_vm0, %v4913_v35  ;;  %v3716_v49 = vor.u32 %v4185_v13, %v3715_v53  ;;  %v3555_v6 = vld [vmem:[%s4481_s17 + $0x488] sm:$0xf] }
 0x12a   : > { %v1999_v43 = vpop.f32.mrf.mxu0  ;;  %v3539_v13 = vld [vmem:[%s4481_s17 + $0x468] sm:$0xf] }
 0x12b   : > { %v2053_v37 = vpop.f32.mrf.mxu2  ;;  %v2027_v50 = vpop.f32.mrf.mxu1  ;;  %v2000_v2 = vadd.f32 %v1999_v43, %v1972_v44  ;;  %2455 = vmatpush.bf16.msrb.mxu1 %v3716_v49  ;;  %v3571_v43 = vld [vmem:[%s4481_s17 + $0x4a8] sm:$0xf]  ;;  %v4141_v49 = vld [vmem:[%s4481_s17 + $0x474] sm:$0xf0] }
 0x12c   : > { %v2054_v57 = vadd.f32 %v2053_v37, %v2026_v21  ;;  %v2081_v42 = vpop.f32.mrf.mxu3  ;;  %v3828_v21 = vor.u32 %v4213_v60, %v3827_v41  ;;  %v3907_v41 = vld [vmem:[%s4481_s17 + $0x748] sm:$0xf]  ;;  %v3540_v60 = vor.u32 %v4141_v49, %v3539_v13 }
 0x12d   : > { %v2028_v11 = vadd.f32 %v2027_v50, %v2000_v2  ;;  %v3699_v2 = vld [vmem:[%s4481_s17 + $0x5a8] sm:$0xf] }
 0x12e   : > { %v2082_v54 = vadd.f32 %v2081_v42, %v2054_v57  ;;  %2484 = vmatpush.bf16.msrb.mxu2 %v3828_v21  ;;  %v3939_v57 = vld [vmem:[%s4481_s17 + $0x788] sm:$0xf]  ;;  %v4241_v42 = vld [vmem:[%s4481_s17 + $0x794] sm:$0xf0]  ;;  %v3700_v39 = vor.u32 %v4181_v40, %v3699_v2 }
 0x12f   : > { %v3940_v50 = vor.u32 %v4241_v42, %v3939_v57  ;;  %v3667_v21 = vld [vmem:[%s4481_s17 + $0x568] sm:$0xf]  ;;  %v4137_v2 = vld [vmem:[%s4481_s17 + $0x454] sm:$0xf0] }
 0x130   : > { %2778 = vst [vmem:[%s5134_s25 + $0x80] sm:$0xff] %v2082_v54  ;;  %v4149_v54 = vld [vmem:[%s4481_s17 + $0x4b4] sm:$0xf0]  ;;  %2456 = vmatpush.bf16.msrb.mxu1 %v3700_v39  ;;  %v3651_v40 = vld [vmem:[%s4481_s17 + $0x548] sm:$0xf] }
 0x131   : > { %v3572_v7 = vor.u32 %v4149_v54, %v3571_v43  ;;  %2513 = vmatpush.bf16.msrb.mxu3 %v3940_v50  ;;  %v3523_v54 = vld [vmem:[%s4481_s17 + $0x448] sm:$0xf] }
 0x132   : > { %v2002_v4 = vpop.f32.mrf.mxu0  ;;  %2485 = vmatpush.bf16.msrb.mxu2 %v3812_v45  ;;  %v3524_v39 = vor.u32 %v4137_v2, %v3523_v54  ;;  %v4229_v45 = vld [vmem:[%s4481_s17 + $0x734] sm:$0xf0]  ;;  %v3635_v13 = vld [vmem:[%s4481_s17 + $0x528] sm:$0xf] }
 0x133   : > { %v2055_v9 = vpop.f32.mrf.mxu2  ;;  %v2030_v63 = vpop.f32.mrf.mxu1  ;;  %v2003_v14 = vadd.f32 %v2002_v4, %v1975_v55  ;;  %2428 = vmatpush.bf16.msrb.mxu0 %v3572_v7  ;;  %v3683_v55 = vld [vmem:[%s4481_s17 + $0x588] sm:$0xf]  ;;  %v4129_v54 = vld [vmem:[%s4481_s17 + $0x414] sm:$0xf0] }
 0x134   : > { %v2056_v38 = vadd.f32 %v2055_v9, %v2028_v11  ;;  %v2083_v3 = vpop.f32.mrf.mxu3  ;;  %v3924_v11 = vor.u32 %v4237_v47, %v3923_v46  ;;  %v4145_v9 = vld [vmem:[%s4481_s17 + $0x494] sm:$0xf0]  ;;  %v5799_v7 = vld [vmem:[#allocation7_spill] sm:$0xff]  ;;  %v3652_v46 = vor.u32 %v4169_v33, %v3651_v40  ;;  %v3892_v47 = vor.u32 %v4229_v45, %v3891_v12 }
 0x135   : > { %2225 = vmatmul.bf16.gmra.mxu0 %v4944_v15  ;;  %v2031_v20 = vadd.f32 %v2030_v63, %v2003_v14  ;;  %v3795_v63 = vld [vmem:[%s4481_s17 + $0x668] sm:$0xf]  ;;  %v4161_v12 = vld [vmem:[%s4481_s17 + $0x514] sm:$0xf0] }
 0x136   : > { %v2084_v5 = vadd.f32 %v2083_v3, %v2056_v38  ;;  %2253 = vmatmul.bf16.gmra.mxu1 %v4946_v16  ;;  %v4177_v38 = vld [vmem:[%s4481_s17 + $0x594] sm:$0xf0]  ;;  %v3556_v3 = vor.u32 %v4145_v9, %v3555_v6  ;;  %2514 = vmatpush.bf16.msrb.mxu3 %v3924_v11  ;;  %v5802_v6 = vld [vmem:[#allocation10_spill] sm:$0xff]  ;;  %v3763_v11 = vld [vmem:[%s4481_s17 + $0x628] sm:$0xf] }
 0x137   : > { %v3684_v4 = vor.u32 %v4177_v38, %v3683_v55  ;;  %v4197_v9 = vld [vmem:[%s4481_s17 + $0x634] sm:$0xf0]  ;;  %v3619_v2 = vld [vmem:[%s4481_s17 + $0x508] sm:$0xf] }
 0x138   : > { %2782 = vst [vmem:[%s5134_s25 + $0xa0] sm:$0xff] %v2084_v5  ;;  %2281 = vmatmul.bf16.gmra.mxu2 %v4948_v17  ;;  %v4205_v5 = vld [vmem:[%s4481_s17 + $0x674] sm:$0xf0]  ;;  %2429 = vmatpush.bf16.msrb.mxu0 %v3556_v3  ;;  %v3764_v55 = vor.u32 %v4197_v9, %v3763_v11  ;;  %v5804_v11 = vld [vmem:[#allocation12_spill] sm:$0xff] }
 0x139   : > { %3984 = vmatmul.msk.bf16.gmra.mxu3 %vm1853_vm0, %v4950_v18  ;;  %v3796_v14 = vor.u32 %v4205_v5, %v3795_v63  ;;  %2457 = vmatpush.bf16.msrb.mxu1 %v3684_v4  ;;  %v3507_v5 = vld [vmem:[%s4481_s17 + $0x428] sm:$0xf]  ;;  %v5805_v9 = vld [vmem:[#allocation13_spill] sm:$0xff] }
 0x13a   : > { %v2004_v58 = vpop.f32.mrf.mxu0 }
 0x13b   : > { %v2058_v59 = vpop.f32.mrf.mxu2  ;;  %v2032_v44 = vpop.f32.mrf.mxu1  ;;  %2486 = vmatpush.bf16.msrb.mxu2 %v3796_v14  ;;  %v3779_v58 = vld [vmem:[%s4481_s17 + $0x648] sm:$0xf]  ;;  %v4133_v14 = vld [vmem:[%s4481_s17 + $0x434] sm:$0xf0] }
 0x13c   : > { %v2059_v52 = vadd.f32 %v2058_v59, %v2031_v20  ;;  %v2086_v37 = vpop.f32.mrf.mxu3  ;;  %v4233_v20 = vld [vmem:[%s4481_s17 + $0x754] sm:$0xf0]  ;;  %2430 = vmatpush.bf16.msrb.mxu0 %v3540_v60  ;;  %v3508_v49 = vor.u32 %v4133_v14, %v3507_v5  ;;  %v3875_v60 = vld [vmem:[%s4481_s17 + $0x708] sm:$0xf]  ;;  %v4091_v5 = vld [vmem:[%s4481_s17 + $0x2ec] sm:$0xf] }
 0x13d   : > { %v4173_v59 = vld [vmem:[%s4481_s17 + $0x574] sm:$0xf0]  ;;  %v3349_v14 = vld [vmem:[%s4481_s17 + $0x2f8] sm:$0xf0] }
 0x13e   : > { %v2087_v8 = vadd.f32 %v2086_v37, %v2059_v52  ;;  %v3908_v52 = vor.u32 %v4233_v20, %v3907_v41  ;;  %v3668_v37 = vor.u32 %v4173_v59, %v3667_v21  ;;  %v4201_v44 = vld [vmem:[%s4481_s17 + $0x654] sm:$0xf0] }
 0x13f   : > { %v4165_v41 = vld [vmem:[%s4481_s17 + $0x534] sm:$0xf0] }
 0x140   : > { %2786 = vst [vmem:[%s5134_s25 + $0xc0] sm:$0x1] %v2087_v8  ;;  %v3780_v8 = vor.u32 %v4201_v44, %v3779_v58  ;;  %2515 = vmatpush.bf16.msrb.mxu3 %v3908_v52  ;;  %2458 = vmatpush.bf16.msrb.mxu1 %v3668_v37  ;;  %v4225_v20 = vld [vmem:[%s4481_s17 + $0x714] sm:$0xf0]  ;;  %v3636_v21 = vor.u32 %v4165_v41, %v3635_v13  ;;  %v3747_v52 = vld [vmem:[%s4481_s17 + $0x608] sm:$0xf] }
 0x141   : > { %2431 = vmatpush.bf16.msrb.mxu0 %v3524_v39  ;;  %v3876_v59 = vor.u32 %v4225_v20, %v3875_v60  ;;  %v4193_v37 = vld [vmem:[%s4481_s17 + $0x614] sm:$0xf0]  ;;  %v4123_v13 = vld [vmem:[%s4481_s17 + $0x3ec] sm:$0xf]  ;;  %v3477_v41 = vld [vmem:[%s4481_s17 + $0x3f8] sm:$0xf0] }
 0x142   : > { %v5229_v0 = vpop.f32.mrf.mxu0  ;;  %2487 = vmatpush.bf16.msrb.mxu2 %v3780_v8  ;;  %v3748_v58 = vor.u32 %v4193_v37, %v3747_v52  ;;  %v3491_v8 = vld [vmem:[%s4481_s17 + $0x408] sm:$0xf]  ;;  %v3480_v20 = vor.u32 %v4123_v13, %v3477_v41  ;;  %v4027_v37 = vld [vmem:[%s4481_s17 + $0xec] sm:$0xf]  ;;  %v3461_v13 = vld [vmem:[%s4481_s17 + $0x3d8] sm:$0xf0] }
 0x143   : > { %v2060_v10 = vpop.f32.mrf.mxu2  ;;  %v5231_v48 = vpop.f32.mrf.mxu1  ;;  %v3492_v33 = vor.u32 %v4129_v54, %v3491_v8  ;;  %v4059_v8 = vld [vmem:[%s4481_s17 + $0x1ec] sm:$0xf] }
 0x144   : > { %v2088_v22 = vpop.f32.mrf.mxu3  ;;  %v5800_v10 = vld [vmem:[#allocation8_spill] sm:$0xff]  ;;  %2459 = vmatpush.bf16.msrb.mxu1 %v3652_v46  ;;  %2516 = vmatpush.bf16.msrb.mxu3 %v3892_v47  ;;  %v3620_v46 = vor.u32 %v4161_v12, %v3619_v2  ;;  %v5803_v47 = vld [vmem:[#allocation11_spill] sm:$0xff]  ;;  %v3221_v2 = vld [vmem:[%s4481_s17 + $0x1f8] sm:$0xf0] }
 0x145   : > { %2322 = vmatmul.bf16.vlgmr.msra.gmra.mxu0 %v4582_v56  ;;  %v5801_v22 = vld [vmem:[#allocation9_spill] sm:$0xff] }
 0x146   : > { %2350 = vmatmul.bf16.vlgmr.msra.gmra.mxu1 %v4587_v61  ;;  %2488 = vmatpush.bf16.msrb.mxu2 %v3764_v55  ;;  %v5806_v55 = vld [vmem:[#allocation14_spill] sm:$0xff]  ;;  %v3333_v12 = vld [vmem:[%s4481_s17 + $0x2d8] sm:$0xf0] }
 0x147   : > { %2432 = vmatpush.bf16.msrb.mxu0 %v3508_v49  ;;  %v3352_v49 = vor.u32 %v4091_v5, %v3349_v14  ;;  %v4119_v14 = vld [vmem:[%s4481_s17 + $0x3cc] sm:$0xf] }
 0x148   : > { %2378 = vmatmul.bf16.vlgmr.msra.gmra.mxu2 %v4589_v62  ;;  %2460 = vmatpush.bf16.msrb.mxu1 %v3636_v21 }
 0x149   : > { %2406 = vmatmul.bf16.vlgmr.msra.gmra.mxu3 %v4593_v1 }
 0x14a   : > { %v5249_v53 = vpop.f32.mrf.mxu0  ;;  %2517 = vmatpush.bf16.msrb.mxu3 %v3876_v59  ;;  %2489 = vmatpush.bf16.msrb.mxu2 %v3748_v58  ;;  %v3093_v58 = vld [vmem:[%s4481_s17 + $0xf8] sm:$0xf0] }
 0x14b   : > { %v5245_v34 = vpop.f32.mrf.mxu2  ;;  %v5251_v36 = vpop.f32.mrf.mxu1  ;;  %2433 = vmatpush.bf16.msrb.mxu0 %v3492_v33  ;;  %v3096_v54 = vor.u32 %v4027_v37, %v3093_v58  ;;  %v4087_v33 = vld [vmem:[%s4481_s17 + $0x2cc] sm:$0xf] }
 0x14c   : > { %v5247_v51 = vpop.f32.mrf.mxu3  ;;  %2461 = vmatpush.bf16.msrb.mxu1 %v3620_v46  ;;  %v3224_v46 = vor.u32 %v4059_v8, %v3221_v2  ;;  %v3336_v5 = vor.u32 %v4087_v33, %v3333_v12  ;;  %v5807_v8 = vld [vmem:[#allocation15_spill] sm:$0xff]  ;;  %v5808_v2 = vld [vmem:[#allocation16_spill] sm:$0xff]  ;;  %v3077_v12 = vld [vmem:[%s4481_s17 + $0xd8] sm:$0xf0] }
 0x14d   : > { %v4023_v33 = vld [vmem:[%s4481_s17 + $0xcc] sm:$0xf] }
 0x14e   : > { %2594 = vmatpush.bf16.msra.mxu2 %v3352_v49  ;;  %2622 = vmatpush.bf16.msra.mxu3 %v3480_v20  ;;  %v3464_v49 = vor.u32 %v4119_v14, %v3461_v13  ;;  %v4055_v14 = vld [vmem:[%s4481_s17 + $0x1cc] sm:$0xf]  ;;  %v5810_v13 = vld [vmem:[#allocation18_spill] sm:$0xff] }
 0x14f   : > { %2538 = vmatpush.bf16.msra.mxu0 %v3096_v54  ;;  %v5809_v54 = vld [vmem:[#allocation17_spill] sm:$0xff] }
 0x150   : > { %2566 = vmatpush.bf16.msra.mxu1 %v3224_v46  ;;  %v4083_v46 = vld [vmem:[%s4481_s17 + $0x2ac] sm:$0xf] }
 0x152   : > { %v5265_v43 = vpop.f32.mrf.mxu0  ;;  %2595 = vmatpush.bf16.msra.mxu2 %v3336_v5  ;;  %2623 = vmatpush.bf16.msra.mxu3 %v3464_v49  ;;  %v3317_v5 = vld [vmem:[%s4481_s17 + $0x2b8] sm:$0xf0]  ;;  %v4115_v49 = vld [vmem:[%s4481_s17 + $0x3ac] sm:$0xf] }
 0x153   : > { %v5261_v57 = vpop.f32.mrf.mxu2  ;;  %v5267_v50 = vpop.f32.mrf.mxu1 }
 0x154   : > { %v5263_v42 = vpop.f32.mrf.mxu3 }
 0x155   : > { %2327 = vmatmul.bf16.gmra.mxu0 %v5799_v7  ;;  %v3429_v7 = vld [vmem:[%s4481_s17 + $0x398] sm:$0xf0] }
 0x156   : > { %2355 = vmatmul.bf16.gmra.mxu1 %v5800_v10 }
 0x158   : > { %2383 = vmatmul.bf16.gmra.mxu2 %v5801_v22  ;;  %v3189_v22 = vld [vmem:[%s4481_s17 + $0x1b8] sm:$0xf0] }
 0x159   : > { %2411 = vmatmul.bf16.gmra.mxu3 %v5802_v6  ;;  %v4051_v6 = vld [vmem:[%s4481_s17 + $0x1ac] sm:$0xf] }
 0x15a   : > { %v5285_v4 = vpop.f32.mrf.mxu0  ;;  %v3192_v10 = vor.u32 %v4051_v6, %v3189_v22  ;;  %v2130_v22 = vadd.f32 %v5251_v36, %v5249_v53  ;;  %v4047_v6 = vld [vmem:[%s4481_s17 + $0x18c] sm:$0xf]  ;;  %v3285_v36 = vld [vmem:[%s4481_s17 + $0x278] sm:$0xf0] }
 0x15b   : > { %v5281_v38 = vpop.f32.mrf.mxu2  ;;  %v5287_v63 = vpop.f32.mrf.mxu1  ;;  %v4075_v53 = vld [vmem:[%s4481_s17 + $0x26c] sm:$0xf] }
 0x15c   : > { %v5283_v3 = vpop.f32.mrf.mxu3 }
 0x162   : > { %v5304_v39 = vpop.f32.mrf.mxu0 }
 0x163   : > { %v5297_v44 = vpop.f32.mrf.mxu2  ;;  %v5307_v45 = vpop.f32.mrf.mxu1 }
 0x164   : > { %v5302_v40 = vpop.f32.mrf.mxu3 }
 0x165   : > { %2332 = vmatmul.bf16.gmra.mxu0 %v5803_v47  ;;  %v3320_v47 = vor.u32 %v4083_v46, %v3317_v5  ;;  %v4019_v46 = vld [vmem:[%s4481_s17 + $0xac] sm:$0xf]  ;;  %v3061_v5 = vld [vmem:[%s4481_s17 + $0xb8] sm:$0xf0] }
 0x166   : > { %2360 = vmatmul.bf16.gmra.mxu1 %v5804_v11 }
 0x167   : > { %2596 = vmatpush.bf16.msra.mxu2 %v3320_v47 }
 0x168   : > { %2388 = vmatmul.bf16.gmra.mxu2 %v5805_v9  ;;  %v3205_v9 = vld [vmem:[%s4481_s17 + $0x1d8] sm:$0xf0] }
 0x169   : > { %2416 = vmatmul.bf16.gmra.mxu3 %v5806_v55  ;;  %v3080_v55 = vor.u32 %v4023_v33, %v3077_v12  ;;  %v3208_v11 = vor.u32 %v4055_v14, %v3205_v9  ;;  %v2128_v33 = vadd.f32 %v5231_v48, %v5229_v0  ;;  %v4111_v48 = vld [vmem:[%s4481_s17 + $0x38c] sm:$0xf] }
 0x16a   : > { %v5321_v59 = vpop.f32.mrf.mxu0  ;;  %v3432_v47 = vor.u32 %v4111_v48, %v3429_v7  ;;  %v2158_v7 = vadd.f32 %v5261_v57, %v2130_v22  ;;  %v2133_v48 = vadd.f32 %v5267_v50, %v5265_v43  ;;  %v4043_v50 = vld [vmem:[%s4481_s17 + $0x16c] sm:$0xf] }
 0x16b   : > { %v5317_v60 = vpop.f32.mrf.mxu2  ;;  %v5323_v52 = vpop.f32.mrf.mxu1  ;;  %2539 = vmatpush.bf16.msra.mxu0 %v3080_v55  ;;  %2567 = vmatpush.bf16.msra.mxu1 %v3208_v11  ;;  %v2156_v14 = vadd.f32 %v5245_v34, %v2128_v33  ;;  %v3064_v55 = vor.u32 %v4019_v46, %v3061_v5  ;;  %v3288_v5 = vor.u32 %v4075_v53, %v3285_v36  ;;  %v4103_v53 = vld [vmem:[%s4481_s17 + $0x34c] sm:$0xf]  ;;  %v3397_v36 = vld [vmem:[%s4481_s17 + $0x358] sm:$0xf0] }
 0x16c   : > { %v5319_v21 = vpop.f32.mrf.mxu3 }
 0x16d   : > { %v2184_v11 = vadd.f32 %v5247_v51, %v2156_v14  ;;  %v4015_v51 = vld [vmem:[%s4481_s17 + $0x8c] sm:$0xf] }
 0x16f   : > { %2540 = vmatpush.bf16.msra.mxu0 %v3064_v55  ;;  %2568 = vmatpush.bf16.msra.mxu1 %v3192_v10  ;;  %v3045_v10 = vld [vmem:[%s4481_s17 + $0x98] sm:$0xf0]  ;;  %v4107_v55 = vld [vmem:[%s4481_s17 + $0x36c] sm:$0xf] }
 0x170   : > { %v3048_v33 = vor.u32 %v4015_v51, %v3045_v10  ;;  %v3157_v51 = vld [vmem:[%s4481_s17 + $0x178] sm:$0xf0]  ;;  %v4071_v10 = vld [vmem:[%s4481_s17 + $0x24c] sm:$0xf] }
 0x172   : > { %v5337_v37 = vpop.f32.mrf.mxu0 }
 0x173   : > { %v5333_v41 = vpop.f32.mrf.mxu2  ;;  %v5339_v58 = vpop.f32.mrf.mxu1  ;;  %2541 = vmatpush.bf16.msra.mxu0 %v3048_v33  ;;  %v3160_v33 = vor.u32 %v4043_v50, %v3157_v51 }
 0x174   : > { %v5335_v20 = vpop.f32.mrf.mxu3 }
 0x175   : > { %2337 = vmatmul.bf16.gmra.mxu0 %v5807_v8  ;;  %v3445_v8 = vld [vmem:[%s4481_s17 + $0x3b8] sm:$0xf0] }
 0x176   : > { %2365 = vmatmul.bf16.gmra.mxu1 %v5808_v2 }
 0x178   : > { %2393 = vmatmul.bf16.gmra.mxu2 %v5809_v54  ;;  %v3448_v54 = vor.u32 %v4115_v49, %v3445_v8  ;;  %v4079_v8 = vld [vmem:[%s4481_s17 + $0x28c] sm:$0xf]  ;;  %v3301_v49 = vld [vmem:[%s4481_s17 + $0x298] sm:$0xf0] }
 0x179   : > { %2421 = vmatmul.bf16.gmra.mxu3 %v5810_v13  ;;  %v3304_v0 = vor.u32 %v4079_v8, %v3301_v49  ;;  %v3413_v8 = vld [vmem:[%s4481_s17 + $0x378] sm:$0xf0] }
 0x17a   : > { %v2116_v13 = vpop.f32.mrf.mxu0  ;;  %2624 = vmatpush.bf16.msra.mxu3 %v3448_v54  ;;  %v3416_v49 = vor.u32 %v4107_v55, %v3413_v8 }
 0x17b   : > { %v5353_v2 = vpop.f32.mrf.mxu2  ;;  %v2144_v9 = vpop.f32.mrf.mxu1  ;;  %2597 = vmatpush.bf16.msra.mxu2 %v3304_v0  ;;  %v2186_v0 = vadd.f32 %v5263_v42, %v2158_v7  ;;  %v2161_v42 = vadd.f32 %v5281_v38, %v2133_v48  ;;  %v3029_v7 = vld [vmem:[%s4481_s17 + $0x78] sm:$0xf0] }
 0x17c   : > { %v5357_v12 = vpop.f32.mrf.mxu3  ;;  %v3173_v9 = vld [vmem:[%s4481_s17 + $0x198] sm:$0xf0] }
 0x17d   : > { %v3176_v46 = vor.u32 %v4047_v6, %v3173_v9  ;;  %v3269_v9 = vld [vmem:[%s4481_s17 + $0x258] sm:$0xf0]  ;;  %v2189_v55 = vadd.f32 %v5283_v3, %v2161_v42 }
 0x17e   : > { %2625 = vmatpush.bf16.msra.mxu3 %v3432_v47 }
 0x17f   : > { %2569 = vmatpush.bf16.msra.mxu1 %v3176_v46  ;;  %2598 = vmatpush.bf16.msra.mxu2 %v3288_v5  ;;  %v3272_v46 = vor.u32 %v4071_v10, %v3269_v9  ;;  %v3400_v5 = vor.u32 %v4103_v53, %v3397_v36 }
 0x182   : > { %v2211_v54 = vpop.f32.mrf.mxu0  ;;  %2626 = vmatpush.bf16.msra.mxu3 %v3416_v49 }
 0x183   : > { %v2172_v1 = vpop.f32.mrf.mxu2  ;;  %v2239_v13 = vpop.f32.mrf.mxu1  ;;  %2570 = vmatpush.bf16.msra.mxu1 %v3160_v33  ;;  %2599 = vmatpush.bf16.msra.mxu2 %v3272_v46 }
 0x184   : > { %v2200_v34 = vpop.f32.mrf.mxu3  ;;  %v2212_v1 = vadd.f32 %v2211_v54, %v2184_v11 }
 0x185   : > { %2434 = vmatmul.bf16.vlgmr.msrb.gmra.mxu0 %v4801_v29 }
 0x186   : > { %2462 = vmatmul.bf16.vlgmr.msrb.gmra.mxu1 %v4803_v30  ;;  %v2240_v14 = vadd.f32 %v2239_v13, %v2212_v1  ;;  %v4011_v1 = vld [vmem:[%s4481_s17 + $0x6c] sm:$0xf]  ;;  %2627 = vmatpush.bf16.msra.mxu3 %v3400_v5 }
 0x187   : > { %v3032_v43 = vor.u32 %v4011_v1, %v3029_v7  ;;  %v3253_v1 = vld [vmem:[%s4481_s17 + $0x238] sm:$0xf0]  ;;  %v4099_v7 = vld [vmem:[%s4481_s17 + $0x32c] sm:$0xf] }
 0x188   : > { %2490 = vmatmul.bf16.vlgmr.msrb.gmra.mxu2 %v4805_v31  ;;  %v4003_v5 = vld [vmem:[%s4481_s17 + $0x2c] sm:$0xf] }
 0x189   : > { %3985 = vmatmul.msk.bf16.vlgmr.msrb.gmra.mxu3 %vm1853_vm0, %v4807_v32  ;;  %2542 = vmatpush.bf16.msra.mxu0 %v3032_v43  ;;  %v3381_v43 = vld [vmem:[%s4481_s17 + $0x338] sm:$0xf0] }
 0x18a   : > { %v2213_v34 = vpop.f32.mrf.mxu0  ;;  %v3384_v51 = vor.u32 %v4099_v7, %v3381_v43  ;;  %v3109_v7 = vld [vmem:[%s4481_s17 + $0x118] sm:$0xf0] }
 0x18b   : > { %v2267_v57 = vpop.f32.mrf.mxu2  ;;  %v2241_v54 = vpop.f32.mrf.mxu1  ;;  %v2214_v22 = vadd.f32 %v2213_v34, %v2186_v0  ;;  %v2135_v0 = vadd.f32 %v5287_v63, %v5285_v4  ;;  %v3013_v34 = vld [vmem:[%s4481_s17 + $0x58] sm:$0xf0]  ;;  %v4039_v63 = vld [vmem:[%s4481_s17 + $0x14c] sm:$0xf] }
 0x18c   : > { %v2268_v47 = vadd.f32 %v2267_v57, %v2240_v14  ;;  %v2295_v11 = vpop.f32.mrf.mxu3  ;;  %2628 = vmatpush.bf16.msra.mxu3 %v3384_v51 }
 0x18d   : > { %v2242_v6 = vadd.f32 %v2241_v54, %v2214_v22  ;;  %v2163_v3 = vadd.f32 %v5297_v44, %v2135_v0  ;;  %v3141_v54 = vld [vmem:[%s4481_s17 + $0x158] sm:$0xf0]  ;;  %v4095_v0 = vld [vmem:[%s4481_s17 + $0x30c] sm:$0xf] }
 0x18e   : > { %v2296_v13 = vadd.f32 %v2295_v11, %v2268_v47  ;;  %v4007_v11 = vld [vmem:[%s4481_s17 + $0x4c] sm:$0xf]  ;;  %v3144_v42 = vor.u32 %v4039_v63, %v3141_v54  ;;  %v2981_v63 = vld [vmem:[%s4481_s17 + $0x18] sm:$0xf0] }
 0x18f   : > { %v3016_v4 = vor.u32 %v4007_v11, %v3013_v34  ;;  %v2191_v10 = vadd.f32 %v5302_v40, %v2163_v3  ;;  %v4035_v40 = vld [vmem:[%s4481_s17 + $0x12c] sm:$0xf] }
 0x190   : > { %2763 = vst [vmem:[%s5134_s25 + $0x8] sm:$0xff] %v2296_v13  ;;  %v4067_v13 = vld [vmem:[%s4481_s17 + $0x22c] sm:$0xf]  ;;  %2571 = vmatpush.bf16.msra.mxu1 %v3144_v42 }
 0x191   : > { %2543 = vmatpush.bf16.msra.mxu0 %v3016_v4  ;;  %v3256_v50 = vor.u32 %v4067_v13, %v3253_v1  ;;  %v3999_v4 = vld [vmem:[%s4481_s17 + $0xc] sm:$0xf] }
 0x192   : > { %v2216_v57 = vpop.f32.mrf.mxu0  ;;  %v2984_v1 = vor.u32 %v3999_v4, %v2981_v63 }
 0x193   : > { %v2269_v14 = vpop.f32.mrf.mxu2  ;;  %v2244_v49 = vpop.f32.mrf.mxu1  ;;  %v2217_v47 = vadd.f32 %v2216_v57, %v2189_v55  ;;  %2600 = vmatpush.bf16.msra.mxu2 %v3256_v50  ;;  %v2997_v55 = vld [vmem:[%s4481_s17 + $0x38] sm:$0xf0]  ;;  %v2140_v50 = vadd.f32 %v5323_v52, %v5321_v59  ;;  %v4247_v59 = vld [vmem:[%s4481_s17 + $0x7cc] sm:$0xf] }
 0x194   : > { %v2270_v38 = vadd.f32 %v2269_v14, %v2242_v6  ;;  %v2297_v8 = vpop.f32.mrf.mxu3  ;;  %v2138_v6 = vadd.f32 %v5307_v45, %v5304_v39  ;;  %v3000_v45 = vor.u32 %v4003_v5, %v2997_v55 }
 0x195   : > { %2439 = vmatmul.bf16.gmra.mxu0 %v4854_v25  ;;  %v2245_v22 = vadd.f32 %v2244_v49, %v2217_v47  ;;  %v3237_v49 = vld [vmem:[%s4481_s17 + $0x218] sm:$0xf0] }
 0x196   : > { %v2298_v48 = vadd.f32 %v2297_v8, %v2270_v38  ;;  %2467 = vmatmul.bf16.gmra.mxu1 %v4856_v26  ;;  %v2166_v39 = vadd.f32 %v5317_v60, %v2138_v6  ;;  %v3125_v38 = vld [vmem:[%s4481_s17 + $0x138] sm:$0xf0]  ;;  %v4063_v8 = vld [vmem:[%s4481_s17 + $0x20c] sm:$0xf]  ;;  %2544 = vmatpush.bf16.msra.mxu0 %v3000_v45 }
 0x197   : > { %v3128_v57 = vor.u32 %v4035_v40, %v3125_v38  ;;  %v3240_v3 = vor.u32 %v4063_v8, %v3237_v49  ;;  %v4031_v60 = vld [vmem:[%s4481_s17 + $0x10c] sm:$0xf] }
 0x198   : > { %2767 = vst [vmem:[%s5134_s25 + $0x28] sm:$0xff] %v2298_v48  ;;  %2495 = vmatmul.bf16.gmra.mxu2 %v4858_v27  ;;  %v3365_v48 = vld [vmem:[%s4481_s17 + $0x318] sm:$0xf0]  ;;  %v2194_v54 = vadd.f32 %v5319_v21, %v2166_v39  ;;  %v2168_v21 = vadd.f32 %v5333_v41, %v2140_v50  ;;  %v4219_v6 = vld [vmem:[%s4481_s17 + $0x6ec] sm:$0xf] }
 0x199   : > { %3986 = vmatmul.msk.bf16.gmra.mxu3 %vm1853_vm0, %v4860_v28  ;;  %v3368_v11 = vor.u32 %v4095_v0, %v3365_v48  ;;  %2572 = vmatpush.bf16.msra.mxu1 %v3128_v57  ;;  %v4155_v8 = vld [vmem:[%s4481_s17 + $0x4ec] sm:$0xf]  ;;  %v3605_v57 = vld [vmem:[%s4481_s17 + $0x4f8] sm:$0xf0] }
 0x19a   : > { %v2218_v53 = vpop.f32.mrf.mxu0  ;;  %2601 = vmatpush.bf16.msra.mxu2 %v3240_v3  ;;  %2545 = vmatpush.bf16.msra.mxu0 %v2984_v1  ;;  %v4187_v49 = vld [vmem:[%s4481_s17 + $0x5ec] sm:$0xf]  ;;  %v3608_v0 = vor.u32 %v4155_v8, %v3605_v57 }
 0x19b   : > { %v2272_v44 = vpop.f32.mrf.mxu2  ;;  %v2246_v36 = vpop.f32.mrf.mxu1  ;;  %v2219_v46 = vadd.f32 %v2218_v53, %v2191_v10  ;;  %2629 = vmatpush.bf16.msra.mxu3 %v3368_v11  ;;  %v3973_v53 = vld [vmem:[%s4481_s17 + $0x7d8] sm:$0xf0]  ;;  %v4215_v48 = vld [vmem:[%s4481_s17 + $0x6cc] sm:$0xf] }
 0x19c   : > { %v2273_v33 = vadd.f32 %v2272_v44, %v2245_v22  ;;  %v2300_v9 = vpop.f32.mrf.mxu3  ;;  %v3112_v44 = vor.u32 %v4031_v60, %v3109_v7  ;;  %v3976_v41 = vor.u32 %v4247_v59, %v3973_v53  ;;  %v4243_v11 = vld [vmem:[%s4481_s17 + $0x7ac] sm:$0xf] }
 0x19d   : > { %v2247_v47 = vadd.f32 %v2246_v36, %v2219_v46  ;;  %v2143_v46 = vadd.f32 %v5339_v58, %v5337_v37  ;;  %v4183_v50 = vld [vmem:[%s4481_s17 + $0x5cc] sm:$0xf] }
 0x19e   : > { %v2301_v14 = vadd.f32 %v2300_v9, %v2273_v33  ;;  %2573 = vmatpush.bf16.msra.mxu1 %v3112_v44  ;;  %v3861_v33 = vld [vmem:[%s4481_s17 + $0x6f8] sm:$0xf0]  ;;  %2650 = vmatpush.bf16.msrb.mxu0 %v3608_v0 }
 0x19f   : > { %v3864_v9 = vor.u32 %v4219_v6, %v3861_v33  ;;  %2735 = vmatpush.bf16.msrb.mxu3 %v3976_v41  ;;  %v2171_v37 = vadd.f32 %v5353_v2, %v2143_v46  ;;  %v3589_v44 = vld [vmem:[%s4481_s17 + $0x4d8] sm:$0xf0]  ;;  %v4239_v46 = vld [vmem:[%s4481_s17 + $0x78c] sm:$0xf] }
 0x1a0   : > { %2771 = vst [vmem:[%s5134_s25 + $0x48] sm:$0xff] %v2301_v14  ;;  %v2196_v14 = vadd.f32 %v5335_v20, %v2168_v21  ;;  %v3733_v20 = vld [vmem:[%s4481_s17 + $0x5f8] sm:$0xf0]  ;;  %v4211_v21 = vld [vmem:[%s4481_s17 + $0x6ac] sm:$0xf] }
 0x1a1   : > { %2706 = vmatpush.bf16.msrb.mxu2 %v3864_v9  ;;  %v3736_v58 = vor.u32 %v4187_v49, %v3733_v20  ;;  %v3829_v6 = vld [vmem:[%s4481_s17 + $0x6b8] sm:$0xf0]  ;;  %v4207_v49 = vld [vmem:[%s4481_s17 + $0x68c] sm:$0xf] }
 0x1a2   : > { %v2221_v42 = vpop.f32.mrf.mxu0  ;;  %v3832_v59 = vor.u32 %v4211_v21, %v3829_v6  ;;  %v3813_v0 = vld [vmem:[%s4481_s17 + $0x698] sm:$0xf0]  ;;  %v4171_v21 = vld [vmem:[%s4481_s17 + $0x56c] sm:$0xf] }
 0x1a3   : > { %v2274_v34 = vpop.f32.mrf.mxu2  ;;  %v2249_v43 = vpop.f32.mrf.mxu1  ;;  %v2222_v10 = vadd.f32 %v2221_v42, %v2194_v54  ;;  %2678 = vmatpush.bf16.msrb.mxu1 %v3736_v58  ;;  %v2199_v54 = vadd.f32 %v5357_v12, %v2171_v37  ;;  %v3816_v20 = vor.u32 %v4207_v49, %v3813_v0  ;;  %v3669_v6 = vld [vmem:[%s4481_s17 + $0x578] sm:$0xf0]  ;;  %v5813_v49 = vld [vmem:[#allocation8_spill] sm:$0xff] }
 0x1a4   : > { %v2275_v13 = vadd.f32 %v2274_v34, %v2247_v47  ;;  %v2302_v22 = vpop.f32.mrf.mxu3  ;;  %v3845_v47 = vld [vmem:[%s4481_s17 + $0x6d8] sm:$0xf0] }
 0x1a5   : > { %2444 = vmatmul.bf16.gmra.mxu0 %v4903_v19  ;;  %v2250_v52 = vadd.f32 %v2249_v43, %v2222_v10  ;;  %v3848_v3 = vor.u32 %v4215_v48, %v3845_v47  ;;  %v3957_v34 = vld [vmem:[%s4481_s17 + $0x7b8] sm:$0xf0]  ;;  %v4151_v43 = vld [vmem:[%s4481_s17 + $0x4cc] sm:$0xf] }
 0x1a6   : > { %v2303_v51 = vadd.f32 %v2302_v22, %v2275_v13  ;;  %2472 = vmatmul.bf16.gmra.mxu1 %v4908_v23  ;;  %v3960_v4 = vor.u32 %v4243_v11, %v3957_v34  ;;  %v3717_v10 = vld [vmem:[%s4481_s17 + $0x5d8] sm:$0xf0]  ;;  %v4143_v34 = vld [vmem:[%s4481_s17 + $0x48c] sm:$0xf] }
 0x1a7   : > { %2707 = vmatpush.bf16.msrb.mxu2 %v3848_v3  ;;  %v3720_v12 = vor.u32 %v4183_v50, %v3717_v10  ;;  %v4235_v3 = vld [vmem:[%s4481_s17 + $0x76c] sm:$0xf]  ;;  %v3925_v11 = vld [vmem:[%s4481_s17 + $0x778] sm:$0xf0] }
 0x1a8   : > { %2775 = vst [vmem:[%s5134_s25 + $0x68] sm:$0xff] %v2303_v51  ;;  %2500 = vmatmul.bf16.gmra.mxu2 %v4910_v24  ;;  %2736 = vmatpush.bf16.msrb.mxu3 %v3960_v4  ;;  %v3592_v51 = vor.u32 %v4151_v43, %v3589_v44  ;;  %v3928_v4 = vor.u32 %v4235_v3, %v3925_v11  ;;  %v4139_v44 = vld [vmem:[%s4481_s17 + $0x46c] sm:$0xf]  ;;  %v3541_v50 = vld [vmem:[%s4481_s17 + $0x478] sm:$0xf0] }
 0x1a9   : > { %3987 = vmatmul.msk.bf16.gmra.mxu3 %vm1853_vm0, %v4913_v35  ;;  %2679 = vmatpush.bf16.msrb.mxu1 %v3720_v12  ;;  %v3544_v10 = vor.u32 %v4139_v44, %v3541_v50  ;;  %v3909_v12 = vld [vmem:[%s4481_s17 + $0x758] sm:$0xf0]  ;;  %v4195_v3 = vld [vmem:[%s4481_s17 + $0x62c] sm:$0xf] }
 0x1aa   : > { %v2223_v40 = vpop.f32.mrf.mxu0  ;;  %2651 = vmatpush.bf16.msrb.mxu0 %v3592_v51  ;;  %v4231_v51 = vld [vmem:[%s4481_s17 + $0x74c] sm:$0xf]  ;;  %v5814_v0 = vld [vmem:[#allocation9_spill] sm:$0xff] }
 0x1ab   : > { %v2277_v36 = vpop.f32.mrf.mxu2  ;;  %v2251_v39 = vpop.f32.mrf.mxu1  ;;  %v2224_v38 = vadd.f32 %v2223_v40, %v2196_v14  ;;  %2708 = vmatpush.bf16.msrb.mxu2 %v3832_v59  ;;  %v3672_v59 = vor.u32 %v4171_v21, %v3669_v6  ;;  %v3765_v11 = vld [vmem:[%s4481_s17 + $0x638] sm:$0xf0] }
 0x1ac   : > { %v2278_v5 = vadd.f32 %v2277_v36, %v2250_v52  ;;  %v2305_v55 = vpop.f32.mrf.mxu3  ;;  %v3877_v44 = vld [vmem:[%s4481_s17 + $0x718] sm:$0xf0] }
 0x1ad   : > { %v2252_v63 = vadd.f32 %v2251_v39, %v2224_v38  ;;  %v3573_v39 = vld [vmem:[%s4481_s17 + $0x4b8] sm:$0xf0] }
 0x1ae   : > { %v2306_v45 = vadd.f32 %v2305_v55, %v2278_v5  ;;  %v3941_v5 = vld [vmem:[%s4481_s17 + $0x798] sm:$0xf0]  ;;  %v4147_v55 = vld [vmem:[%s4481_s17 + $0x4ac] sm:$0xf] }
 0x1af   : > { %v3944_v40 = vor.u32 %v4239_v46, %v3941_v5  ;;  %v3701_v38 = vld [vmem:[%s4481_s17 + $0x5b8] sm:$0xf0]  ;;  %v3576_v8 = vor.u32 %v4147_v55, %v3573_v39  ;;  %2709 = vmatpush.bf16.msrb.mxu2 %v3816_v20  ;;  %v4135_v5 = vld [vmem:[%s4481_s17 + $0x44c] sm:$0xf] }
 0x1b0   : > { %2779 = vst [vmem:[%s5134_s25 + $0x88] sm:$0xff] %v2306_v45  ;;  %v4179_v45 = vld [vmem:[%s4481_s17 + $0x5ac] sm:$0xf]  ;;  %v3525_v55 = vld [vmem:[%s4481_s17 + $0x458] sm:$0xf0] }
 0x1b1   : > { %v3704_v57 = vor.u32 %v4179_v45, %v3701_v38  ;;  %2737 = vmatpush.bf16.msrb.mxu3 %v3944_v40  ;;  %2652 = vmatpush.bf16.msrb.mxu0 %v3576_v8  ;;  %v4167_v40 = vld [vmem:[%s4481_s17 + $0x54c] sm:$0xf]  ;;  %v3528_v45 = vor.u32 %v4135_v5, %v3525_v55  ;;  %v3653_v38 = vld [vmem:[%s4481_s17 + $0x558] sm:$0xf0] }
 0x1b2   : > { %v2226_v22 = vpop.f32.mrf.mxu0  ;;  %v5812_v39 = vld [vmem:[#allocation7_spill] sm:$0xff]  ;;  %v3656_v20 = vor.u32 %v4167_v40, %v3653_v38  ;;  %v3621_v55 = vld [vmem:[%s4481_s17 + $0x518] sm:$0xf0]  ;;  %v5817_v38 = vld [vmem:[#allocation12_spill] sm:$0xff] }
 0x1b3   : > { %v2279_v60 = vpop.f32.mrf.mxu2  ;;  %v2254_v42 = vpop.f32.mrf.mxu1  ;;  %v2227_v7 = vadd.f32 %v2226_v22, %v2199_v54  ;;  %2680 = vmatpush.bf16.msrb.mxu1 %v3704_v57  ;;  %v3685_v54 = vld [vmem:[%s4481_s17 + $0x598] sm:$0xf0]  ;;  %v5811_v22 = vld [vmem:[#allocation6_spill] sm:$0xff]  ;;  %v4227_v8 = vld [vmem:[%s4481_s17 + $0x72c] sm:$0xf] }
 0x1b4   : > { %v2280_v2 = vadd.f32 %v2279_v60, %v2252_v63  ;;  %v2307_v13 = vpop.f32.mrf.mxu3  ;;  %v3557_v63 = vld [vmem:[%s4481_s17 + $0x498] sm:$0xf0]  ;;  %v4175_v60 = vld [vmem:[%s4481_s17 + $0x58c] sm:$0xf] }
 0x1b5   : > { %2449 = vmatmul.bf16.gmra.mxu0 %v4944_v15  ;;  %v2255_v33 = vadd.f32 %v2254_v42, %v2227_v7  ;;  %v4203_v42 = vld [vmem:[%s4481_s17 + $0x66c] sm:$0xf]  ;;  %2738 = vmatpush.bf16.msrb.mxu3 %v3928_v4  ;;  %v3893_v57 = vld [vmem:[%s4481_s17 + $0x738] sm:$0xf0] }
 0x1b6   : > { %v2308_v1 = vadd.f32 %v2307_v13, %v2280_v2  ;;  %2477 = vmatmul.bf16.gmra.mxu1 %v4946_v16  ;;  %v3560_v2 = vor.u32 %v4143_v34, %v3557_v63  ;;  %v3688_v13 = vor.u32 %v4175_v60, %v3685_v54  ;;  %v3768_v34 = vor.u32 %v4195_v3, %v3765_v11 }
 0x1b8   : > { %2783 = vst [vmem:[%s5134_s25 + $0xa8] sm:$0xff] %v2308_v1  ;;  %2505 = vmatmul.bf16.gmra.mxu2 %v4948_v17  ;;  %v3797_v1 = vld [vmem:[%s4481_s17 + $0x678] sm:$0xf0]  ;;  %2653 = vmatpush.bf16.msrb.mxu0 %v3560_v2  ;;  %v4131_v2 = vld [vmem:[%s4481_s17 + $0x42c] sm:$0xf] }
 0x1b9   : > { %3988 = vmatmul.msk.bf16.gmra.mxu3 %vm1853_vm0, %v4950_v18  ;;  %2681 = vmatpush.bf16.msrb.mxu1 %v3688_v13  ;;  %v3509_v13 = vld [vmem:[%s4481_s17 + $0x438] sm:$0xf0] }
 0x1ba   : > { %v2228_v36 = vpop.f32.mrf.mxu0 }
 0x1bb   : > { %v2282_v52 = vpop.f32.mrf.mxu2  ;;  %v2256_v41 = vpop.f32.mrf.mxu1 }
 0x1bc   : > { %v2283_v9 = vadd.f32 %v2282_v52, %v2255_v33  ;;  %v2310_v53 = vpop.f32.mrf.mxu3  ;;  %v3912_v33 = vor.u32 %v4231_v51, %v3909_v12  ;;  %v4199_v52 = vld [vmem:[%s4481_s17 + $0x64c] sm:$0xf]  ;;  %2654 = vmatpush.bf16.msrb.mxu0 %v3544_v10  ;;  %v3749_v12 = vld [vmem:[%s4481_s17 + $0x618] sm:$0xf0] }
 0x1bd   : > { %2682 = vmatpush.bf16.msrb.mxu1 %v3672_v59  ;;  %v4191_v10 = vld [vmem:[%s4481_s17 + $0x60c] sm:$0xf]  ;;  %v3493_v59 = vld [vmem:[%s4481_s17 + $0x418] sm:$0xf0] }
 0x1be   : > { %v2311_v14 = vadd.f32 %v2310_v53, %v2283_v9  ;;  %v3781_v9 = vld [vmem:[%s4481_s17 + $0x658] sm:$0xf0]  ;;  %2739 = vmatpush.bf16.msrb.mxu3 %v3912_v33  ;;  %v3752_v21 = vor.u32 %v4191_v10, %v3749_v12  ;;  %v4127_v33 = vld [vmem:[%s4481_s17 + $0x40c] sm:$0xf] }
 0x1bf   : > { %v3784_v53 = vor.u32 %v4199_v52, %v3781_v9  ;;  %v4159_v52 = vld [vmem:[%s4481_s17 + $0x50c] sm:$0xf]  ;;  %v3496_v5 = vor.u32 %v4127_v33, %v3493_v59 }
 0x1c0   : > { %2787 = vst [vmem:[%s5134_s25 + $0xc8] sm:$0x1] %v2311_v14  ;;  %2655 = vmatpush.bf16.msrb.mxu0 %v3528_v45  ;;  %v5816_v45 = vld [vmem:[#allocation11_spill] sm:$0xff] }
 0x1c1   : > { %2683 = vmatpush.bf16.msrb.mxu1 %v3656_v20 }
 0x1c2   : > { %v5482_v37 = vpop.f32.mrf.mxu0 }
 0x1c3   : > { %v2284_v48 = vpop.f32.mrf.mxu2  ;;  %v5484_v58 = vpop.f32.mrf.mxu1 }
 0x1c4   : > { %v2312_v47 = vpop.f32.mrf.mxu3  ;;  %v3896_v48 = vor.u32 %v4227_v8, %v3893_v57  ;;  %v5818_v8 = vld [vmem:[#allocation13_spill] sm:$0xff]  ;;  %v5819_v57 = vld [vmem:[#allocation14_spill] sm:$0xff] }
 0x1c5   : > { %2546 = vmatmul.bf16.vlgmr.msra.gmra.mxu0 %v4582_v56  ;;  %v3800_v56 = vor.u32 %v4203_v42, %v3797_v1  ;;  %v5815_v47 = vld [vmem:[#allocation10_spill] sm:$0xff]  ;;  %v3512_v42 = vor.u32 %v4131_v2, %v3509_v13  ;;  %v3637_v1 = vld [vmem:[%s4481_s17 + $0x538] sm:$0xf0]  ;;  %v5820_v2 = vld [vmem:[#allocation15_spill] sm:$0xff] }
 0x1c6   : > { %2574 = vmatmul.bf16.vlgmr.msra.gmra.mxu1 %v4587_v61  ;;  %2740 = vmatpush.bf16.msrb.mxu3 %v3896_v48  ;;  %v5821_v13 = vld [vmem:[#allocation16_spill] sm:$0xff] }
 0x1c7   : > { %2710 = vmatpush.bf16.msrb.mxu2 %v3800_v56  ;;  %v4223_v56 = vld [vmem:[%s4481_s17 + $0x70c] sm:$0xf]  ;;  %2656 = vmatpush.bf16.msrb.mxu0 %v3512_v42  ;;  %v5823_v42 = vld [vmem:[#allocation18_spill] sm:$0xff] }
 0x1c8   : > { %2602 = vmatmul.bf16.vlgmr.msra.gmra.mxu2 %v4589_v62  ;;  %v3880_v51 = vor.u32 %v4223_v56, %v3877_v44  ;;  %v2352_v56 = vadd.f32 %v5484_v58, %v5482_v37 }
 0x1c9   : > { %2630 = vmatmul.bf16.vlgmr.msra.gmra.mxu3 %v5811_v22  ;;  %v4163_v22 = vld [vmem:[%s4481_s17 + $0x52c] sm:$0xf] }
 0x1ca   : > { %v5502_v62 = vpop.f32.mrf.mxu0  ;;  %v3640_v50 = vor.u32 %v4163_v22, %v3637_v1  ;;  %2741 = vmatpush.bf16.msrb.mxu3 %v3880_v51  ;;  %v5822_v22 = vld [vmem:[#allocation17_spill] sm:$0xff] }
 0x1cb   : > { %v5498_v7 = vpop.f32.mrf.mxu2  ;;  %v5504_v43 = vpop.f32.mrf.mxu1  ;;  %2711 = vmatpush.bf16.msrb.mxu2 %v3784_v53  ;;  %2657 = vmatpush.bf16.msrb.mxu0 %v3496_v5 }
 0x1cc   : > { %v5500_v61 = vpop.f32.mrf.mxu3  ;;  %2684 = vmatpush.bf16.msrb.mxu1 %v3640_v50  ;;  %v2380_v10 = vadd.f32 %v5498_v7, %v2352_v56  ;;  %v2354_v5 = vadd.f32 %v5504_v43, %v5502_v62 }
 0x1cf   : > { %2712 = vmatpush.bf16.msrb.mxu2 %v3768_v34 }
 0x1d2   : > { %v5518_v14 = vpop.f32.mrf.mxu0 }
 0x1d3   : > { %v5514_v36 = vpop.f32.mrf.mxu2  ;;  %v5520_v46 = vpop.f32.mrf.mxu1  ;;  %2713 = vmatpush.bf16.msrb.mxu2 %v3752_v21  ;;  %v2408_v21 = vadd.f32 %v5500_v61, %v2380_v10 }
 0x1d4   : > { %v5516_v41 = vpop.f32.mrf.mxu3  ;;  %v2382_v37 = vadd.f32 %v5514_v36, %v2354_v5  ;;  %v2357_v62 = vadd.f32 %v5520_v46, %v5518_v14 }
 0x1d5   : > { %2551 = vmatmul.bf16.gmra.mxu0 %v5812_v39  ;;  %v3624_v39 = vor.u32 %v4159_v52, %v3621_v55 }
 0x1d6   : > { %2579 = vmatmul.bf16.gmra.mxu1 %v5813_v49  ;;  %v2410_v61 = vadd.f32 %v5516_v41, %v2382_v37 }
 0x1d7   : > { %2685 = vmatpush.bf16.msrb.mxu1 %v3624_v39 }
 0x1d8   : > { %2607 = vmatmul.bf16.gmra.mxu2 %v5814_v0 }
 0x1d9   : > { %2635 = vmatmul.bf16.gmra.mxu3 %v5815_v47 }
 0x1da   : > { %v5538_v60 = vpop.f32.mrf.mxu0 }
 0x1db   : > { %v5534_v4 = vpop.f32.mrf.mxu2  ;;  %v5540_v54 = vpop.f32.mrf.mxu1 }
 0x1dc   : > { %v5536_v63 = vpop.f32.mrf.mxu3  ;;  %v2359_v14 = vadd.f32 %v5540_v54, %v5538_v60 }
 0x1e2   : > { %v5557_v53 = vpop.f32.mrf.mxu0 }
 0x1e3   : > { %v5550_v6 = vpop.f32.mrf.mxu2  ;;  %v5560_v40 = vpop.f32.mrf.mxu1 }
 0x1e4   : > { %v5555_v9 = vpop.f32.mrf.mxu3  ;;  %v2362_v60 = vadd.f32 %v5560_v40, %v5557_v53 }
 0x1e5   : > { %2556 = vmatmul.bf16.gmra.mxu0 %v5816_v45 }
 0x1e6   : > { %2584 = vmatmul.bf16.gmra.mxu1 %v5817_v38 }
 0x1e8   : > { %2612 = vmatmul.bf16.gmra.mxu2 %v5818_v8 }
 0x1e9   : > { %2640 = vmatmul.bf16.gmra.mxu3 %v5819_v57 }
 0x1ea   : > { %v5570_v20 = vpop.f32.mrf.mxu0 }
 0x1eb   : > { %v5566_v49 = vpop.f32.mrf.mxu2  ;;  %v5572_v48 = vpop.f32.mrf.mxu1 }
 0x1ec   : > { %v5568_v0 = vpop.f32.mrf.mxu3  ;;  %v2364_v53 = vadd.f32 %v5572_v48, %v5570_v20 }
 0x1f2   : > { %v5578_v11 = vpop.f32.mrf.mxu0 }
 0x1f3   : > { %v5574_v47 = vpop.f32.mrf.mxu2  ;;  %v5580_v34 = vpop.f32.mrf.mxu1 }
 0x1f4   : > { %v5576_v3 = vpop.f32.mrf.mxu3  ;;  %v2392_v5 = vadd.f32 %v5574_v47, %v2364_v53  ;;  %v2367_v20 = vadd.f32 %v5580_v34, %v5578_v11 }
 0x1f5   : > { %2561 = vmatmul.bf16.gmra.mxu0 %v5820_v2 }
 0x1f6   : > { %2589 = vmatmul.bf16.gmra.mxu1 %v5821_v13 }
 0x1f8   : > { %2617 = vmatmul.bf16.gmra.mxu2 %v5822_v22 }
 0x1f9   : > { %2645 = vmatmul.bf16.gmra.mxu3 %v5823_v42  ;;  %v2387_v42 = vadd.f32 %v5550_v6, %v2359_v14 }
 0x1fa   : > { %v2340_v50 = vpop.f32.mrf.mxu0 }
 0x1fb   : > { %v5586_v1 = vpop.f32.mrf.mxu2  ;;  %v2368_v51 = vpop.f32.mrf.mxu1  ;;  %v2415_v56 = vadd.f32 %v5555_v9, %v2387_v42 }
 0x1fc   : > { %v5590_v44 = vpop.f32.mrf.mxu3 }
 0x202   : > { %v2435_v59 = vpop.f32.mrf.mxu0 }
 0x203   : > { %v2396_v12 = vpop.f32.mrf.mxu2  ;;  %v2463_v52 = vpop.f32.mrf.mxu1  ;;  %v2436_v55 = vadd.f32 %v2435_v59, %v2408_v21 }
 0x204   : > { %v2424_v33 = vpop.f32.mrf.mxu3 }
 0x205   : > { %2658 = vmatmul.bf16.vlgmr.msrb.gmra.mxu0 %v4801_v29  ;;  %v2464_v58 = vadd.f32 %v2463_v52, %v2436_v55  ;;  %v2420_v55 = vadd.f32 %v5576_v3, %v2392_v5 }
 0x206   : > { %2686 = vmatmul.bf16.vlgmr.msrb.gmra.mxu1 %v4803_v30  ;;  %v2385_v30 = vadd.f32 %v5534_v4, %v2357_v62 }
 0x208   : > { %2714 = vmatmul.bf16.vlgmr.msrb.gmra.mxu2 %v4805_v31 }
 0x209   : > { %3989 = vmatmul.msk.bf16.vlgmr.msrb.gmra.mxu3 %vm1853_vm0, %v4807_v32  ;;  %v2413_v32 = vadd.f32 %v5536_v63, %v2385_v30 }
 0x20a   : > { %v2437_v29 = vpop.f32.mrf.mxu0 }
 0x20b   : > { %v2491_v7 = vpop.f32.mrf.mxu2  ;;  %v2465_v45 = vpop.f32.mrf.mxu1  ;;  %v2438_v36 = vadd.f32 %v2437_v29, %v2410_v61 }
 0x20c   : > { %v2492_v43 = vadd.f32 %v2491_v7, %v2464_v58  ;;  %v2519_v39 = vpop.f32.mrf.mxu3 }
 0x20d   : > { %v2466_v31 = vadd.f32 %v2465_v45, %v2438_v36 }
 0x20e   : > { %v2520_v38 = vadd.f32 %v2519_v39, %v2492_v43 }
 0x210   : > { %2764 = vst [vmem:[%s5134_s25 + $0x10] sm:$0xff] %v2520_v38 }
 0x212   : > { %v2440_v41 = vpop.f32.mrf.mxu0 }
 0x213   : > { %v2493_v8 = vpop.f32.mrf.mxu2  ;;  %v2468_v13 = vpop.f32.mrf.mxu1  ;;  %v2441_v22 = vadd.f32 %v2440_v41, %v2413_v32 }
 0x214   : > { %v2494_v57 = vadd.f32 %v2493_v8, %v2466_v31  ;;  %v2521_v2 = vpop.f32.mrf.mxu3 }
 0x215   : > { %2663 = vmatmul.bf16.gmra.mxu0 %v4854_v25  ;;  %v2469_v4 = vadd.f32 %v2468_v13, %v2441_v22 }
 0x216   : > { %v2522_v46 = vadd.f32 %v2521_v2, %v2494_v57  ;;  %2691 = vmatmul.bf16.gmra.mxu1 %v4856_v26  ;;  %v2390_v26 = vadd.f32 %v5566_v49, %v2362_v60 }
 0x218   : > { %2768 = vst [vmem:[%s5134_s25 + $0x30] sm:$0xff] %v2522_v46  ;;  %2719 = vmatmul.bf16.gmra.mxu2 %v4858_v27 }
 0x219   : > { %3990 = vmatmul.msk.bf16.gmra.mxu3 %vm1853_vm0, %v4860_v28  ;;  %v2418_v28 = vadd.f32 %v5568_v0, %v2390_v26 }
 0x21a   : > { %v2442_v50 = vpop.f32.mrf.mxu0 }
 0x21b   : > { %v2496_v63 = vpop.f32.mrf.mxu2  ;;  %v2470_v6 = vpop.f32.mrf.mxu1  ;;  %v2443_v10 = vadd.f32 %v2442_v50, %v2415_v56 }
 0x21c   : > { %v2497_v54 = vadd.f32 %v2496_v63, %v2469_v4  ;;  %v2524_v25 = vpop.f32.mrf.mxu3 }
 0x21d   : > { %v2471_v27 = vadd.f32 %v2470_v6, %v2443_v10 }
 0x21e   : > { %v2525_v51 = vadd.f32 %v2524_v25, %v2497_v54 }
 0x220   : > { %2772 = vst [vmem:[%s5134_s25 + $0x50] sm:$0xff] %v2525_v51 }
 0x222   : > { %v2445_v9 = vpop.f32.mrf.mxu0 }
 0x223   : > { %v2498_v12 = vpop.f32.mrf.mxu2  ;;  %v2473_v59 = vpop.f32.mrf.mxu1  ;;  %v2446_v52 = vadd.f32 %v2445_v9, %v2418_v28 }
 0x224   : > { %v2499_v21 = vadd.f32 %v2498_v12, %v2471_v27  ;;  %v2526_v33 = vpop.f32.mrf.mxu3 }
 0x225   : > { %2668 = vmatmul.bf16.gmra.mxu0 %v4903_v19  ;;  %v2474_v49 = vadd.f32 %v2473_v59, %v2446_v52 }
 0x226   : > { %v2527_v40 = vadd.f32 %v2526_v33, %v2499_v21  ;;  %2696 = vmatmul.bf16.gmra.mxu1 %v4908_v23  ;;  %v2395_v23 = vadd.f32 %v5586_v1, %v2367_v20 }
 0x228   : > { %2776 = vst [vmem:[%s5134_s25 + $0x70] sm:$0xff] %v2527_v40  ;;  %2724 = vmatmul.bf16.gmra.mxu2 %v4910_v24 }
 0x229   : > { %3991 = vmatmul.msk.bf16.gmra.mxu3 %vm1853_vm0, %v4913_v35  ;;  %v2423_v35 = vadd.f32 %v5590_v44, %v2395_v23 }
 0x22a   : > { %v2447_v37 = vpop.f32.mrf.mxu0 }
 0x22b   : > { %v2501_v0 = vpop.f32.mrf.mxu2  ;;  %v2475_v47 = vpop.f32.mrf.mxu1  ;;  %v2448_v7 = vadd.f32 %v2447_v37, %v2420_v55 }
 0x22c   : > { %v2502_v48 = vadd.f32 %v2501_v0, %v2474_v49  ;;  %v2529_v19 = vpop.f32.mrf.mxu3 }
 0x22d   : > { %v2476_v24 = vadd.f32 %v2475_v47, %v2448_v7 }
 0x22e   : > { %v2530_v58 = vadd.f32 %v2529_v19, %v2502_v48 }
 0x230   : > { %2780 = vst [vmem:[%s5134_s25 + $0x90] sm:$0xff] %v2530_v58 }
 0x232   : > { %v2450_v3 = vpop.f32.mrf.mxu0 }
 0x233   : > { %v2503_v61 = vpop.f32.mrf.mxu2  ;;  %v2478_v39 = vpop.f32.mrf.mxu1  ;;  %v2451_v34 = vadd.f32 %v2450_v3, %v2423_v35 }
 0x234   : > { %v2504_v62 = vadd.f32 %v2503_v61, %v2476_v24  ;;  %v2531_v43 = vpop.f32.mrf.mxu3 }
 0x235   : > { %2673 = vmatmul.bf16.gmra.mxu0 %v4944_v15  ;;  %v2479_v1 = vadd.f32 %v2478_v39, %v2451_v34 }
 0x236   : > { %v2532_v11 = vadd.f32 %v2531_v43, %v2504_v62  ;;  %2701 = vmatmul.bf16.gmra.mxu1 %v4946_v16 }
 0x238   : > { %2784 = vst [vmem:[%s5134_s25 + $0xb0] sm:$0xff] %v2532_v11  ;;  %2729 = vmatmul.bf16.gmra.mxu2 %v4948_v17 }
 0x239   : > { %3992 = vmatmul.msk.bf16.gmra.mxu3 %vm1853_vm0, %v4950_v18 }
 0x23a   : > { %v2452_v38 = vpop.f32.mrf.mxu0 }
 0x23b   : > { %v2506_v29 = vpop.f32.mrf.mxu2  ;;  %v2480_v36 = vpop.f32.mrf.mxu1 }
 0x23c   : > { %v2507_v44 = vadd.f32 %v2506_v29, %v2479_v1  ;;  %v2534_v45 = vpop.f32.mrf.mxu3 }
 0x23e   : > { %v2535_v30 = vadd.f32 %v2534_v45, %v2507_v44 }
 0x240   : > { %2788 = vst [vmem:[%s5134_s25 + $0xd0] sm:$0x1] %v2535_v30 }
 0x242   : > { %v2547_v32 = vpop.f32.mrf.mxu0 }
 0x243   : > { %v2508_v31 = vpop.f32.mrf.mxu2  ;;  %v2575_v15 = vpop.f32.mrf.mxu1 }
 0x244   : > { %v2536_v8 = vpop.f32.mrf.mxu3  ;;  %v2576_v21 = vadd.f32 %v2575_v15, %v2547_v32 }
 0x24a   : > { %v2549_v16 = vpop.f32.mrf.mxu0 }
 0x24b   : > { %v2603_v57 = vpop.f32.mrf.mxu2  ;;  %v2577_v41 = vpop.f32.mrf.mxu1 }
 0x24c   : > { %v2631_v2 = vpop.f32.mrf.mxu3  ;;  %v2604_v53 = vadd.f32 %v2603_v57, %v2576_v21  ;;  %v2578_v55 = vadd.f32 %v2577_v41, %v2549_v16 }
 0x24e   : > { %v2632_v52 = vadd.f32 %v2631_v2, %v2604_v53 }
 0x252   : > { %v2552_v14 = vpop.f32.mrf.mxu0 }
 0x253   : > { %v2605_v17 = vpop.f32.mrf.mxu2  ;;  %v2580_v18 = vpop.f32.mrf.mxu1 }
 0x254   : > { %v2633_v13 = vpop.f32.mrf.mxu3  ;;  %v2606_v48 = vadd.f32 %v2605_v17, %v2578_v55  ;;  %v2581_v58 = vadd.f32 %v2580_v18, %v2552_v14 }
 0x256   : > { %v2634_v47 = vadd.f32 %v2633_v13, %v2606_v48 }
 0x25a   : > { %v2554_v42 = vpop.f32.mrf.mxu0 }
 0x25b   : > { %v2608_v46 = vpop.f32.mrf.mxu2  ;;  %v2582_v4 = vpop.f32.mrf.mxu1 }
 0x25c   : > { %v2636_v22 = vpop.f32.mrf.mxu3  ;;  %v2609_v43 = vadd.f32 %v2608_v46, %v2581_v58  ;;  %v2583_v45 = vadd.f32 %v2582_v4, %v2554_v42 }
 0x25e   : > { %v2637_v11 = vadd.f32 %v2636_v22, %v2609_v43  ;;  %v2816_v43 = vld [vmem:[%s5134_s25 + $0x8] sm:$0xff] (%p4462_p9) }
 0x25f   : > { %2817 = vst [vmem:[%s5681_s27 + $0x8] sm:$0xff] (%p4462_p9), %v2816_v43 }
 0x262   : > { %v2557_v60 = vpop.f32.mrf.mxu0 }
 0x263   : > { %v2610_v63 = vpop.f32.mrf.mxu2  ;;  %v2585_v54 = vpop.f32.mrf.mxu1 }
 0x264   : > { %v2638_v56 = vpop.f32.mrf.mxu3  ;;  %v2611_v30 = vadd.f32 %v2610_v63, %v2583_v45  ;;  %v2586_v15 = vadd.f32 %v2585_v54, %v2557_v60  ;;  %v2832_v45 = vld [vmem:[%s5134_s25 + $0x48] sm:$0xff] (%p4462_p9) }
 0x265   : > { %2833 = vst [vmem:[%s5681_s27 + $0x88] sm:$0xff] (%p4462_p9), %v2832_v45 }
 0x266   : > { %v2639_v32 = vadd.f32 %v2638_v56, %v2611_v30  ;;  %v2838_v30 = vld [vmem:[%s5134_s25 + $0x60] sm:$0xff] (%p4462_p9) }
 0x267   : > { %2839 = vst [vmem:[%s5681_s27 + $0xc0] sm:$0xff] (%p4462_p9), %v2838_v30 }
 0x26a   : > { %v5645_v6 = vpop.f32.mrf.mxu0 }
 0x26b   : > { %v2613_v25 = vpop.f32.mrf.mxu2  ;;  %v2587_v51 = vpop.f32.mrf.mxu1 }
 0x26c   : > { %v2641_v50 = vpop.f32.mrf.mxu3  ;;  %v2614_v14 = vadd.f32 %v2613_v25, %v2586_v15  ;;  %v2846_v15 = vld [vmem:[%s5134_s25 + $0x80] sm:$0xff] (%p4462_p9) }
 0x26d   : > { %2847 = vst [vmem:[%s5681_s27 + $0x100] sm:$0xff] (%p4462_p9), %v2846_v15 }
 0x26e   : > { %v2642_v22 = vadd.f32 %v2641_v50, %v2614_v14 }
 0x272   : > { %v5651_v27 = vpop.f32.mrf.mxu0 }
 0x273   : > { %v5647_v10 = vpop.f32.mrf.mxu2  ;;  %v5653_v12 = vpop.f32.mrf.mxu1 }
 0x274   : > { %v5649_v26 = vpop.f32.mrf.mxu3 }
 0x27a   : > { %v2564_v9 = vpop.f32.mrf.mxu0 }
 0x27b   : > { %v5655_v28 = vpop.f32.mrf.mxu2  ;;  %v2592_v59 = vpop.f32.mrf.mxu1  ;;  %v2588_v9 = vadd.f32 %v2587_v51, %v5645_v6 }
 0x27c   : > { %v5657_v33 = vpop.f32.mrf.mxu3 }
 0x27d   : > { %v2616_v54 = vadd.f32 %v5647_v10, %v2588_v9 }
 0x27f   : > { %v2644_v25 = vadd.f32 %v5649_v26, %v2616_v54 }
 0x282   : > { %v2659_v49 = vpop.f32.mrf.mxu0 }
 0x283   : > { %v2620_v40 = vpop.f32.mrf.mxu2  ;;  %v2687_v0 = vpop.f32.mrf.mxu1  ;;  %v2660_v20 = vadd.f32 %v2659_v49, %v2632_v52 }
 0x284   : > { %v2648_v5 = vpop.f32.mrf.mxu3  ;;  %v2591_v40 = vadd.f32 %v5653_v12, %v5651_v27 }
 0x285   : > { %v2688_v19 = vadd.f32 %v2687_v0, %v2660_v20 }
 0x286   : > { %v2619_v51 = vadd.f32 %v5655_v28, %v2591_v40 }
 0x288   : > { %v2647_v20 = vadd.f32 %v5657_v33, %v2619_v51  ;;  %v2814_v33 = vld [vmem:[%s5134_s25] sm:$0xff] (%p4462_p9) }
 0x289   : > { %2815 = vst [vmem:[%s5681_s27] sm:$0xff] (%p4462_p9), %v2814_v33 }
 0x28a   : > { %v2661_v24 = vpop.f32.mrf.mxu0 }
 0x28b   : > { %v2715_v37 = vpop.f32.mrf.mxu2  ;;  %v2689_v61 = vpop.f32.mrf.mxu1  ;;  %v2662_v62 = vadd.f32 %v2661_v24, %v2634_v47 }
 0x28c   : > { %v2716_v7 = vadd.f32 %v2715_v37, %v2688_v19  ;;  %v2743_v23 = vpop.f32.mrf.mxu3 }
 0x28d   : > { %v2690_v3 = vadd.f32 %v2689_v61, %v2662_v62 }
 0x28e   : > { %v2744_v35 = vadd.f32 %v2743_v23, %v2716_v7 }
 0x290   : > { %2765 = vst [vmem:[%s5134_s25 + $0x18] sm:$0xff] %v2744_v35 }
 0x292   : > { %v2664_v29 = vpop.f32.mrf.mxu0 }
 0x293   : > { %v2717_v39 = vpop.f32.mrf.mxu2  ;;  %v2692_v44 = vpop.f32.mrf.mxu1  ;;  %v2665_v36 = vadd.f32 %v2664_v29, %v2637_v11  ;;  %v2822_v11 = vld [vmem:[%s5134_s25 + $0x20] sm:$0xff] (%p4462_p9) }
 0x294   : > { %v2718_v34 = vadd.f32 %v2717_v39, %v2690_v3  ;;  %v2745_v1 = vpop.f32.mrf.mxu3  ;;  %v2818_v3 = vld [vmem:[%s5134_s25 + $0x10] sm:$0xff] (%p4462_p9)  ;;  %2823 = vst [vmem:[%s5681_s27 + $0x40] sm:$0xff] (%p4462_p9), %v2822_v11 }
 0x295   : > { %v2693_v31 = vadd.f32 %v2692_v44, %v2665_v36  ;;  %2819 = vst [vmem:[%s5681_s27 + $0x10] sm:$0xff] (%p4462_p9), %v2818_v3  ;;  %v2830_v44 = vld [vmem:[%s5134_s25 + $0x40] sm:$0xff] (%p4462_p9) }
 0x296   : > { %v2746_v38 = vadd.f32 %v2745_v1, %v2718_v34  ;;  %v2824_v34 = vld [vmem:[%s5134_s25 + $0x28] sm:$0xff] (%p4462_p9)  ;;  %v2826_v1 = vld [vmem:[%s5134_s25 + $0x30] sm:$0xff] (%p4462_p9)  ;;  %2831 = vst [vmem:[%s5681_s27 + $0x80] sm:$0xff] (%p4462_p9), %v2830_v44 }
 0x297   : > { %v2820_v39 = vld [vmem:[%s5134_s25 + $0x18] sm:$0xff] (%p4462_p9)  ;;  %2825 = vst [vmem:[%s5681_s27 + $0x48] sm:$0xff] (%p4462_p9), %v2824_v34 }
 0x298   : > { %2769 = vst [vmem:[%s5134_s25 + $0x38] sm:$0xff] %v2746_v38  ;;  %v2834_v38 = vld [vmem:[%s5134_s25 + $0x50] sm:$0xff] (%p4462_p9) }
 0x299   : > { %2821 = vst [vmem:[%s5681_s27 + $0x18] sm:$0xff] (%p4462_p9), %v2820_v39 }
 0x29a   : > { %v2666_v16 = vpop.f32.mrf.mxu0  ;;  %2827 = vst [vmem:[%s5681_s27 + $0x50] sm:$0xff] (%p4462_p9), %v2826_v1 }
 0x29b   : > { %v2720_v8 = vpop.f32.mrf.mxu2  ;;  %v2694_v41 = vpop.f32.mrf.mxu1  ;;  %v2667_v13 = vadd.f32 %v2666_v16, %v2639_v32  ;;  %2835 = vst [vmem:[%s5681_s27 + $0x90] sm:$0xff] (%p4462_p9), %v2834_v38 }
 0x29c   : > { %v2721_v57 = vadd.f32 %v2720_v8, %v2693_v31  ;;  %v2748_v2 = vpop.f32.mrf.mxu3  ;;  %v2840_v31 = vld [vmem:[%s5134_s25 + $0x68] sm:$0xff] (%p4462_p9)  ;;  %v2842_v8 = vld [vmem:[%s5134_s25 + $0x70] sm:$0xff] (%p4462_p9) }
 0x29d   : > { %v2695_v18 = vadd.f32 %v2694_v41, %v2667_v13  ;;  %2841 = vst [vmem:[%s5681_s27 + $0xc8] sm:$0xff] (%p4462_p9), %v2840_v31  ;;  %v2854_v41 = vld [vmem:[%s5134_s25 + $0xa0] sm:$0xff] (%p4462_p9)  ;;  %v2858_v13 = vld [vmem:[%s5134_s25 + $0xb0] sm:$0xff] (%p4462_p9) }
 0x29e   : > { %v2749_v17 = vadd.f32 %v2748_v2, %v2721_v57  ;;  %2843 = vst [vmem:[%s5681_s27 + $0xd0] sm:$0xff] (%p4462_p9), %v2842_v8  ;;  %v2848_v57 = vld [vmem:[%s5134_s25 + $0x88] sm:$0xff] (%p4462_p9)  ;;  %v2850_v2 = vld [vmem:[%s5134_s25 + $0x90] sm:$0xff] (%p4462_p9) }
 0x29f   : > { %v2828_v29 = vld [vmem:[%s5134_s25 + $0x38] sm:$0xff] (%p4462_p9)  ;;  %2849 = vst [vmem:[%s5681_s27 + $0x108] sm:$0xff] (%p4462_p9), %v2848_v57 }
 0x2a0   : > { %2773 = vst [vmem:[%s5134_s25 + $0x58] sm:$0xff] %v2749_v17  ;;  %v2856_v17 = vld [vmem:[%s5134_s25 + $0xa8] sm:$0xff] (%p4462_p9) }
 0x2a1   : > { %2829 = vst [vmem:[%s5681_s27 + $0x58] sm:$0xff] (%p4462_p9), %v2828_v29 }
 0x2a2   : > { %v2669_v63 = vpop.f32.mrf.mxu0  ;;  %2851 = vst [vmem:[%s5681_s27 + $0x110] sm:$0xff] (%p4462_p9), %v2850_v2 }
 0x2a3   : > { %v2722_v46 = vpop.f32.mrf.mxu2  ;;  %v2697_v21 = vpop.f32.mrf.mxu1  ;;  %v2670_v60 = vadd.f32 %v2669_v63, %v2642_v22  ;;  %2855 = vst [vmem:[%s5681_s27 + $0x140] sm:$0xff] (%p4462_p9), %v2854_v41  ;;  %v2866_v22 = vld [vmem:[%s5134_s25 + $0xd0] sm:$0xff] (%p4462_p9) }
 0x2a4   : > { %v2723_v42 = vadd.f32 %v2722_v46, %v2695_v18  ;;  %v2750_v4 = vpop.f32.mrf.mxu3  ;;  %2857 = vst [vmem:[%s5681_s27 + $0x148] sm:$0xff] (%p4462_p9), %v2856_v17  ;;  %v2862_v18 = vld [vmem:[%s5134_s25 + $0xc0] sm:$0xff] (%p4462_p9)  ;;  %v2864_v46 = vld [vmem:[%s5134_s25 + $0xc8] sm:$0xff] (%p4462_p9) }
 0x2a5   : > { %v2698_v59 = vadd.f32 %v2697_v21, %v2670_v60  ;;  %2859 = vst [vmem:[%s5681_s27 + $0x150] sm:$0xff] (%p4462_p9), %v2858_v13 }
 0x2a6   : > { %v2751_v56 = vadd.f32 %v2750_v4, %v2723_v42  ;;  %2863 = vst [vmem:[%s5681_s27 + $0x180] sm:$0xff] (%p4462_p9), %v2862_v18 }
 0x2a7   : > { %v2836_v36 = vld [vmem:[%s5134_s25 + $0x58] sm:$0xff] (%p4462_p9)  ;;  %2865 = vst [vmem:[%s5681_s27 + $0x188] sm:$0xff] (%p4462_p9), %v2864_v46 }
 0x2a8   : > { %2777 = vst [vmem:[%s5134_s25 + $0x78] sm:$0xff] %v2751_v56 }
 0x2a9   : > { %2837 = vst [vmem:[%s5681_s27 + $0x98] sm:$0xff] (%p4462_p9), %v2836_v36 }
 0x2aa   : > { %v2671_v5 = vpop.f32.mrf.mxu0  ;;  %2867 = vst [vmem:[%s5681_s27 + $0x190] sm:$0xff] (%p4462_p9), %v2866_v22 }
 0x2ab   : > { %v2725_v53 = vpop.f32.mrf.mxu2  ;;  %v2699_v49 = vpop.f32.mrf.mxu1  ;;  %v2672_v6 = vadd.f32 %v2671_v5, %v2644_v25 }
 0x2ac   : > { %v2726_v50 = vadd.f32 %v2725_v53, %v2698_v59  ;;  %v2753_v52 = vpop.f32.mrf.mxu3 }
 0x2ad   : > { %v2700_v55 = vadd.f32 %v2699_v49, %v2672_v6 }
 0x2ae   : > { %v2754_v0 = vadd.f32 %v2753_v52, %v2726_v50 }
 0x2af   : > { %v2844_v32 = vld [vmem:[%s5134_s25 + $0x78] sm:$0xff] (%p4462_p9) }
 0x2b0   : > { %2781 = vst [vmem:[%s5134_s25 + $0x98] sm:$0xff] %v2754_v0 }
 0x2b1   : > { %2845 = vst [vmem:[%s5681_s27 + $0xd8] sm:$0xff] (%p4462_p9), %v2844_v32 }
 0x2b2   : > { %v2674_v19 = vpop.f32.mrf.mxu0 }
 0x2b3   : > { %v2727_v10 = vpop.f32.mrf.mxu2  ;;  %v2702_v37 = vpop.f32.mrf.mxu1  ;;  %v2675_v12 = vadd.f32 %v2674_v19, %v2647_v20 }
 0x2b4   : > { %v2728_v48 = vadd.f32 %v2727_v10, %v2700_v55  ;;  %v2755_v26 = vpop.f32.mrf.mxu3 }
 0x2b5   : > { %v2703_v47 = vadd.f32 %v2702_v37, %v2675_v12 }
 0x2b6   : > { %v2756_v27 = vadd.f32 %v2755_v26, %v2728_v48 }
 0x2b7   : > { %v2852_v16 = vld [vmem:[%s5134_s25 + $0x98] sm:$0xff] (%p4462_p9) }
 0x2b8   : > { %2785 = vst [vmem:[%s5134_s25 + $0xb8] sm:$0xff] %v2756_v27 }
 0x2b9   : > { %2853 = vst [vmem:[%s5681_s27 + $0x118] sm:$0xff] (%p4462_p9), %v2852_v16 }
 0x2ba   : > { %v2676_v24 = vpop.f32.mrf.mxu0 }
 0x2bb   : > { %v2730_v58 = vpop.f32.mrf.mxu2  ;;  %v2704_v61 = vpop.f32.mrf.mxu1 }
 0x2bc   : > { %v2731_v7 = vadd.f32 %v2730_v58, %v2703_v47  ;;  %v2758_v23 = vpop.f32.mrf.mxu3 }
 0x2be   : > { %v2759_v28 = vadd.f32 %v2758_v23, %v2731_v7 }
 0x2bf   : > { %v2860_v14 = vld [vmem:[%s5134_s25 + $0xb8] sm:$0xff] (%p4462_p9) }
 0x2c0   : > { %2789 = vst [vmem:[%s5134_s25 + $0xd8] sm:$0x1] %v2759_v28  ;;  %2796 = sbr.rel (!%p4462_p9) target bundleno = 713 (0x2c9), region = 36 }
 0x2c1   : > { %2861 = vst [vmem:[%s5681_s27 + $0x158] sm:$0xff] (%p4462_p9), %v2860_v14 }
 0x2c3   : > { %v2732_v35 = vpop.f32.mrf.mxu2 }
 0x2c4   : > { %v2760_v62 = vpop.f32.mrf.mxu3 }
 0x2c7   : > { %v2868_v42 = vld [vmem:[%s5134_s25 + $0xd8] sm:$0xff] }
 0x2c8   : > { %2869 = vst [vmem:[%s5681_s27 + $0x198] sm:$0xff] %v2868_v42 }
 0x2c9 PF: > { %s15_s14 = sadd.s32 1, %s4392_s14   ;;  %s5824_s9 = smov %s4376_s10 }
 0x2ca   : > { %p12_p1 = scmp.ge.s32.totalorder %s15_s14, 4   ;;  %s5825_s10 = smov %s4380_s11 }
 0x2cb   : > { %s5826_s11 = smov %s4460_s21  ;;  %s5827_s12 = smov %s4388_s13 }
 0x2cc   : > { %s5828_s13 = smov %s5830_s16  ;;  %14 = sbr.rel (!%p12_p1) target bundleno = 4 (0x4), region = 94 }
 0x2d1   :  { %2885 = vsyncpa [#allocation3], 1 }
 0x2d2   :  { %2887 = vsyncpa [#allocation3 + $0x1], 1 }

</bundles_post_ra>
